<compile_context>
chip_gen: v5e
topology: v5e:2x2
jax: 0.10.0
libtpu: 0.0.40
codegen_flags: <defaults>
</compile_context>

<pallas_src>
import functools

import jax
import jax.numpy as jnp
from jax import lax
from jax.experimental import pallas as pl
from jax.experimental.pallas import tpu as pltpu

LANE = 128


def _round_up(v, m):
    return (v + m - 1) // m * m


def _pad_axis(x, target, axis):
    pad = target - x.shape[axis]
    if pad == 0:
        return x
    widths = [(0, 0)] * x.ndim
    widths[axis] = (0, pad)
    return jnp.pad(x, widths)


def _fold_bn(gamma, beta, mean, var, eps):
    scale = gamma.astype(jnp.float32) * lax.rsqrt(var.astype(jnp.float32) + eps)
    bias = beta.astype(jnp.float32) - mean.astype(jnp.float32) * scale
    return scale, bias


# ----------------------------------------------------------------------------
# Fused kernel
# ----------------------------------------------------------------------------
def _make_kernel(*, H, W, Cin_p, Ch_p, Cout_p, stride, has_expand, use_res):
    Ho, Wo = H // stride, W // stride

    def kernel(*refs):
        refs = list(refs)
        n_x = 1 if stride == 1 else 2
        x_refs = refs[:n_x]
        i = n_x
        if has_expand:
            w1_ref, s1_ref, b1_ref = refs[i:i + 3]
            i += 3
        wdw_ref, s2_ref, b2_ref, w2_ref, s3_ref, b3_ref = refs[i:i + 6]
        i += 6
        o_ref = refs[i]
        scratch = refs[i + 1:]

        def expand(x_ref, w_cols):
            # 1x1 conv + BN + ReLU6 as one MXU matmul over flattened pixels.
            x2d = x_ref[0].astype(jnp.float32).reshape(H * w_cols, Cin_p)
            if has_expand:
                h = jnp.dot(x2d, w1_ref[...],
                            preferred_element_type=jnp.float32)
                h = h * s1_ref[...] + b1_ref[...]
                h = jnp.clip(h, 0.0, 6.0)
            else:
                h = x2d
            return h.reshape(H, w_cols, Ch_p), x2d

        if stride == 1:
            # Zero-padded hidden activation lives entirely in VMEM scratch.
            hpad = scratch[0]                       # (H+2, W+2, Ch_p)
            hpad[...] = jnp.zeros_like(hpad)
            h3, x2d = expand(x_refs[0], W)
            hpad[1:H + 1, 1:W + 1, :] = h3

            acc = jnp.zeros((H, W, Ch_p), jnp.float32)
            for di in range(3):
                for dj in range(3):
                    w_tap = wdw_ref[3 * di + dj:3 * di + dj + 1, :]  # (1, Ch_p)
                    acc = acc + hpad[di:di + H, dj:dj + W, :] * w_tap
        else:
            # stride == 2: hidden stored as two column-parity scratches
            # (even / odd *padded* columns) so every access is dense.
            sc_even, sc_odd = scratch               # (H+2, Wo+1, Ch_p) each
            sc_even[...] = jnp.zeros_like(sc_even)
            sc_odd[...] = jnp.zeros_like(sc_odd)
            h_ev, _ = expand(x_refs[0], Wo)         # even unpadded columns
            h_od, _ = expand(x_refs[1], Wo)         # odd  unpadded columns
            # padded col p = j + 1:  odd-parity p  <- even unpadded cols
            #                        even-parity p <- odd  unpadded cols
            sc_odd[1:H + 1, 0:Wo, :] = h_ev
            sc_even[1:H + 1, 1:Wo + 1, :] = h_od

            def dec_rows(ref, di):
                # ref[di::2][:Ho] using only leading-dim reshape + slice.
                slab = ref[di:di + 2 * Ho]          # (2*Ho, Wo+1, Ch_p)
                slab = slab.reshape(Ho, 2, Wo + 1, Ch_p)
                return slab[:, 0, :, :]

            acc = jnp.zeros((Ho, Wo, Ch_p), jnp.float32)
            for di in range(3):
                r_even = dec_rows(sc_even, di)
                r_odd = dec_rows(sc_odd, di)
                acc = acc + r_even[:, 0:Wo, :] * wdw_ref[3 * di + 0:3 * di + 1, :]
                acc = acc + r_odd[:, 0:Wo, :] * wdw_ref[3 * di + 1:3 * di + 2, :]
                acc = acc + r_even[:, 1:Wo + 1, :] * wdw_ref[3 * di + 2:3 * di + 3, :]
            x2d = None

        # Depthwise BN + ReLU6 (per-channel scale/bias broadcast, hoisted).
        acc = acc * s2_ref[...] + b2_ref[...]
        acc = jnp.clip(acc, 0.0, 6.0)

        # 1x1 projection (MXU matmul) + BN (+ fused residual add).
        y = jnp.dot(acc.reshape(Ho * Wo, Ch_p), w2_ref[...],
                    preferred_element_type=jnp.float32)
        y = y * s3_ref[...] + b3_ref[...]
        if use_res:
            y = y + x2d
        o_ref[0] = y.reshape(Ho, Wo, Cout_p).astype(o_ref.dtype)

    return kernel


# ----------------------------------------------------------------------------
# Wrapper: fold BN, pad channels to 128 lanes, build specs, call the kernel
# ----------------------------------------------------------------------------
@functools.partial(jax.jit, static_argnames=("stride", "expand_ratio", "eps"))
def inverted_residual_forward(x_nchw, params, *, stride, expand_ratio, eps=1e-5):
    assert stride in (1, 2)
    N, Cin, H, W = x_nchw.shape
    has_expand = expand_ratio != 1
    hidden = int(Cin * expand_ratio)
    oup = params["w2"].shape[0]
    use_res = (stride == 1) and (Cin == oup)
    if stride == 2:
        assert H % 2 == 0 and W % 2 == 0, "stride-2 path assumes even H, W"

    Cin_p = _round_up(Cin, LANE)
    Ch_p = _round_up(hidden, LANE)
    Cout_p = _round_up(oup, LANE)
    Ho, Wo = H // stride, W // stride

    # NHWC, channels padded to the 128-lane boundary (lane-dense I/O).
    x = jnp.transpose(x_nchw.astype(jnp.float32), (0, 2, 3, 1))
    x = _pad_axis(x, Cin_p, axis=3)

    inputs, in_specs = [], []
    if stride == 1:
        inputs.append(x)
        in_specs.append(pl.BlockSpec((1, H, W, Cin_p), lambda n: (n, 0, 0, 0)))
    else:
        inputs.append(x[:, :, 0::2, :])   # even unpadded columns
        inputs.append(x[:, :, 1::2, :])   # odd  unpadded columns
        spec = pl.BlockSpec((1, H, Wo, Cin_p), lambda n: (n, 0, 0, 0))
        in_specs.extend([spec, spec])

    def const_spec(shape):
        nd = len(shape)
        return pl.BlockSpec(shape, lambda n, _nd=nd: (0,) * _nd)

    if has_expand:
        w1 = params["w1"][:, :, 0, 0].astype(jnp.float32).T        # (inp, hidden)
        w1 = _pad_axis(_pad_axis(w1, Cin_p, 0), Ch_p, 1)
        s1, b1 = _fold_bn(*params["bn1"], eps)
        s1 = _pad_axis(s1, Ch_p, 0).reshape(1, Ch_p)
        b1 = _pad_axis(b1, Ch_p, 0).reshape(1, Ch_p)
        inputs += [w1, s1, b1]
        in_specs += [const_spec((Cin_p, Ch_p)), const_spec((1, Ch_p)),
                     const_spec((1, Ch_p))]

    wdw = params["wdw"][:, 0, :, :].astype(jnp.float32)            # (hidden, 3, 3)
    wdw = jnp.transpose(wdw, (1, 2, 0)).reshape(9, hidden)         # row = 3*kh + kw
    wdw = _pad_axis(wdw, Ch_p, 1)
    s2, b2 = _fold_bn(*params["bn2"], eps)
    s2 = _pad_axis(s2, Ch_p, 0).reshape(1, Ch_p)
    b2 = _pad_axis(b2, Ch_p, 0).reshape(1, Ch_p)

    w2 = params["w2"][:, :, 0, 0].astype(jnp.float32).T            # (hidden, oup)
    w2 = _pad_axis(_pad_axis(w2, Ch_p, 0), Cout_p, 1)
    s3, b3 = _fold_bn(*params["bn3"], eps)
    s3 = _pad_axis(s3, Cout_p, 0).reshape(1, Cout_p)
    b3 = _pad_axis(b3, Cout_p, 0).reshape(1, Cout_p)

    inputs += [wdw, s2, b2, w2, s3, b3]
    in_specs += [const_spec((9, Ch_p)), const_spec((1, Ch_p)),
                 const_spec((1, Ch_p)), const_spec((Ch_p, Cout_p)),
                 const_spec((1, Cout_p)), const_spec((1, Cout_p))]

    if stride == 1:
        scratch_shapes = [pltpu.VMEM((H + 2, W + 2, Ch_p), jnp.float32)]
    else:
        scratch_shapes = [pltpu.VMEM((H + 2, Wo + 1, Ch_p), jnp.float32),
                          pltpu.VMEM((H + 2, Wo + 1, Ch_p), jnp.float32)]

    kernel = _make_kernel(H=H, W=W, Cin_p=Cin_p, Ch_p=Ch_p, Cout_p=Cout_p,
                          stride=stride, has_expand=has_expand, use_res=use_res)

    out = pl.pallas_call(
        kernel,
        out_shape=jax.ShapeDtypeStruct((N, Ho, Wo, Cout_p), jnp.float32),
        grid_spec=pltpu.PrefetchScalarGridSpec(
            num_scalar_prefetch=0,
            grid=(N,),
            in_specs=in_specs,
            out_specs=pl.BlockSpec((1, Ho, Wo, Cout_p),
                                   lambda n: (n, 0, 0, 0)),
            scratch_shapes=scratch_shapes,
        ),
        compiler_params=pltpu.CompilerParams(
            dimension_semantics=("parallel",),
            vmem_limit_bytes=48 * 1024 * 1024,
        ),
    )(*inputs)

    out = out[..., :oup]                                  # drop channel padding
    return jnp.transpose(out, (0, 3, 1, 2))               # back to NCHW


# ----------------------------------------------------------------------------
# Pure-XLA reference (mirrors the PyTorch module, inference-mode BatchNorm)
# ----------------------------------------------------------------------------
def inverted_residual_reference(x, params, *, stride, expand_ratio, eps=1e-5):
    Cin = x.shape[1]
    oup = params["w2"].shape[0]
    hidden = int(Cin * expand_ratio)
    use_res = stride == 1 and Cin == oup

    def bn(y, p):
        g, b, m, v = p
        s = g / jnp.sqrt(v + eps)
        return y * s[None, :, None, None] + (b - m * s)[None, :, None, None]

    dn = ("NCHW", "OIHW", "NCHW")
    y = x.astype(jnp.float32)
    if expand_ratio != 1:
        y = lax.conv_general_dilated(y, params["w1"].astype(jnp.float32),
                                     (1, 1), "VALID", dimension_numbers=dn)
        y = jnp.clip(bn(y, params["bn1"]), 0.0, 6.0)
    y = lax.conv_general_dilated(y, params["wdw"].astype(jnp.float32),
                                 (stride, stride), ((1, 1), (1, 1)),
                                 dimension_numbers=dn,
                                 feature_group_count=hidden)
    y = jnp.clip(bn(y, params["bn2"]), 0.0, 6.0)
    y = lax.conv_general_dilated(y, params["w2"].astype(jnp.float32),
                                 (1, 1), "VALID", dimension_numbers=dn)
    y = bn(y, params["bn3"])
    if use_res:
        y = y + x.astype(jnp.float32)
    return y


def make_params(key, inp, oup, expand_ratio):
    hidden = int(inp * expand_ratio)
    ks = jax.random.split(key, 6)

    def bn_params(k, c):
        k1, k2, k3, k4 = jax.random.split(k, 4)
        return (jax.random.uniform(k1, (c,), jnp.float32, 0.5, 1.5),
                0.1 * jax.random.normal(k2, (c,), jnp.float32),
                0.1 * jax.random.normal(k3, (c,), jnp.float32),
                jax.random.uniform(k4, (c,), jnp.float32, 0.5, 1.5))

    p = {}
    if expand_ratio != 1:
        p["w1"] = 0.2 * jax.random.normal(ks[0], (hidden, inp, 1, 1), jnp.float32)
        p["bn1"] = bn_params(ks[1], hidden)
    p["wdw"] = 0.2 * jax.random.normal(ks[2], (hidden, 1, 3, 3), jnp.float32)
    p["bn2"] = bn_params(ks[3], hidden)
    p["w2"] = 0.2 * jax.random.normal(ks[4], (oup, hidden, 1, 1), jnp.float32)
    p["bn3"] = bn_params(ks[5], oup)
    return p


if __name__ == "__main__":
    key = jax.random.PRNGKey(0)
    N, H, W = 2, 16, 16
    configs = [
        # (inp, oup, stride, expand_ratio)
        (16, 16, 1, 6),   # expand, residual branch
        (16, 24, 2, 6),   # expand, stride 2, no residual
        (16, 16, 1, 1),   # expand_ratio == 1 branch, residual
    ]
    for idx, (inp, oup, stride, er) in enumerate(configs):
        kx, kp, key = jax.random.split(key, 3)
        x = jax.random.normal(kx, (N, inp, H, W), jnp.float32)
        params = make_params(kp, inp, oup, er)

        y = inverted_residual_forward(x, params, stride=stride, expand_ratio=er)
        y = jax.block_until_ready(y)

        y_ref = inverted_residual_reference(x, params, stride=stride,
                                            expand_ratio=er)
        if y.shape != y_ref.shape:
            raise SystemExit(f"config {idx}: shape {y.shape} != {y_ref.shape}")
        err = float(jnp.max(jnp.abs(y - y_ref)))
        tol = 1e-3 + 2e-2 * float(jnp.max(jnp.abs(y_ref)))
        if not err < tol:
            raise SystemExit(f"config {idx}: max abs err {err} > tol {tol}")
    print("KERNEL_OK")
</pallas_src>

<mosaic_0001>
module attributes {stable_mosaic.version = 11 : i64} {
  func.func @kernel(%arg0: i32, %arg1: memref<1x16x16x128xf32, #tpu.memory_space<vmem>>, %arg2: memref<128x128xf32, #tpu.memory_space<vmem>>, %arg3: memref<1x128xf32, #tpu.memory_space<vmem>>, %arg4: memref<1x128xf32, #tpu.memory_space<vmem>>, %arg5: memref<9x128xf32, #tpu.memory_space<vmem>>, %arg6: memref<1x128xf32, #tpu.memory_space<vmem>>, %arg7: memref<1x128xf32, #tpu.memory_space<vmem>>, %arg8: memref<128x128xf32, #tpu.memory_space<vmem>>, %arg9: memref<1x128xf32, #tpu.memory_space<vmem>>, %arg10: memref<1x128xf32, #tpu.memory_space<vmem>>, %arg11: memref<1x16x16x128xf32, #tpu.memory_space<vmem>>, %arg12: memref<18x18x128xf32, #tpu.memory_space<vmem>>) attributes {dimension_semantics = [#tpu.dimension_semantics<parallel>], iteration_bounds = array<i64: 2>, scalar_prefetch = 0 : i64, scratch_operands = 1 : i64, tpu.core_type = #tpu.core_type<tc>, window_params = [{transform_indices = @transform_0, window_bounds = array<i64: 1, 16, 16, 128>}, {pipeline_mode = #tpu.pipeline_mode<synchronous>, transform_indices = @transform_1, window_bounds = array<i64: 128, 128>}, {pipeline_mode = #tpu.pipeline_mode<synchronous>, transform_indices = @transform_2, window_bounds = array<i64: 1, 128>}, {pipeline_mode = #tpu.pipeline_mode<synchronous>, transform_indices = @transform_3, window_bounds = array<i64: 1, 128>}, {pipeline_mode = #tpu.pipeline_mode<synchronous>, transform_indices = @transform_4, window_bounds = array<i64: 9, 128>}, {pipeline_mode = #tpu.pipeline_mode<synchronous>, transform_indices = @transform_5, window_bounds = array<i64: 1, 128>}, {pipeline_mode = #tpu.pipeline_mode<synchronous>, transform_indices = @transform_6, window_bounds = array<i64: 1, 128>}, {pipeline_mode = #tpu.pipeline_mode<synchronous>, transform_indices = @transform_7, window_bounds = array<i64: 128, 128>}, {pipeline_mode = #tpu.pipeline_mode<synchronous>, transform_indices = @transform_8, window_bounds = array<i64: 1, 128>}, {pipeline_mode = #tpu.pipeline_mode<synchronous>, transform_indices = @transform_9, window_bounds = array<i64: 1, 128>}, {transform_indices = @transform_10, window_bounds = array<i64: 1, 16, 16, 128>}]} {
    %cst = arith.constant 0.000000e+00 : f32
    %0 = vector.broadcast %cst : f32 to vector<18x18x128xf32>
    %c0 = arith.constant 0 : index
    %c0_0 = arith.constant 0 : index
    %c0_1 = arith.constant 0 : index
    %1 = vector.load %arg12[%c0, %c0_0, %c0_1] : memref<18x18x128xf32, #tpu.memory_space<vmem>>, vector<18x18x128xf32>
    tpu.vector_store %arg12[%c0, %c0_0, %c0_1], %0 {strides = array<i32>} : memref<18x18x128xf32, #tpu.memory_space<vmem>>, vector<18x18x128xf32>,
    %c0_2 = arith.constant 0 : index
    %c0_3 = arith.constant 0 : index
    %c0_4 = arith.constant 0 : index
    %c0_5 = arith.constant 0 : index
    %2 = vector.load %arg1[%c0_2, %c0_3, %c0_4, %c0_5] : memref<1x16x16x128xf32, #tpu.memory_space<vmem>>, vector<1x16x16x128xf32>
    %3 = vector.shape_cast %2 : vector<1x16x16x128xf32> to vector<16x16x128xf32>
    %4 = vector.shape_cast %3 : vector<16x16x128xf32> to vector<256x128xf32>
    %c0_6 = arith.constant 0 : index
    %c0_7 = arith.constant 0 : index
    %5 = vector.load %arg2[%c0_6, %c0_7] : memref<128x128xf32, #tpu.memory_space<vmem>>, vector<128x128xf32>
    %cst_8 = arith.constant dense<0.000000e+00> : vector<256x128xf32>
    %6 = tpu.matmul %4, %5, %cst_8 {dimension_numbers = #tpu.dot_dimension_numbers<[1], [0], [0], [1], [0, 0, 1, 1], [], []>} : vector<256x128xf32>, vector<128x128xf32>, vector<256x128xf32> -> vector<256x128xf32>
    %c0_9 = arith.constant 0 : index
    %c0_10 = arith.constant 0 : index
    %7 = vector.load %arg3[%c0_9, %c0_10] : memref<1x128xf32, #tpu.memory_space<vmem>>, vector<1x128xf32>
    %8 = vector.broadcast %7 : vector<1x128xf32> to vector<256x128xf32>
    %9 = arith.mulf %6, %8 : vector<256x128xf32>
    %c0_11 = arith.constant 0 : index
    %c0_12 = arith.constant 0 : index
    %10 = vector.load %arg4[%c0_11, %c0_12] : memref<1x128xf32, #tpu.memory_space<vmem>>, vector<1x128xf32>
    %11 = vector.broadcast %10 : vector<1x128xf32> to vector<256x128xf32>
    %12 = arith.addf %9, %11 : vector<256x128xf32>
    %cst_13 = arith.constant 0.000000e+00 : f32
    %cst_14 = arith.constant 6.000000e+00 : f32
    %13 = vector.broadcast %cst_13 : f32 to vector<256x128xf32>
    %14 = arith.maximumf %13, %12 : vector<256x128xf32>
    %15 = vector.broadcast %cst_14 : f32 to vector<256x128xf32>
    %16 = arith.minimumf %15, %14 : vector<256x128xf32>
    %17 = vector.shape_cast %16 : vector<256x128xf32> to vector<16x16x128xf32>
    %c1 = arith.constant 1 : index
    %c1_15 = arith.constant 1 : index
    %c0_16 = arith.constant 0 : index
    %18 = vector.load %arg12[%c1, %c1_15, %c0_16] : memref<18x18x128xf32, #tpu.memory_space<vmem>>, vector<16x16x128xf32>
    tpu.vector_store %arg12[%c1, %c1_15, %c0_16], %17 {strides = array<i32>} : memref<18x18x128xf32, #tpu.memory_space<vmem>>, vector<16x16x128xf32>,
    %cst_17 = arith.constant 0.000000e+00 : f32
    %19 = vector.broadcast %cst_17 : f32 to vector<16x16x128xf32>
    %c0_18 = arith.constant 0 : index
    %c0_19 = arith.constant 0 : index
    %20 = vector.load %arg5[%c0_18, %c0_19] : memref<9x128xf32, #tpu.memory_space<vmem>>, vector<1x128xf32>
    %c0_20 = arith.constant 0 : index
    %c0_21 = arith.constant 0 : index
    %c0_22 = arith.constant 0 : index
    %21 = vector.load %arg12[%c0_20, %c0_21, %c0_22] : memref<18x18x128xf32, #tpu.memory_space<vmem>>, vector<16x16x128xf32>
    %22 = vector.shape_cast %20 : vector<1x128xf32> to vector<1x1x128xf32>
    %23 = vector.broadcast %22 : vector<1x1x128xf32> to vector<16x16x128xf32>
    %24 = arith.mulf %21, %23 : vector<16x16x128xf32>
    %25 = arith.addf %19, %24 : vector<16x16x128xf32>
    %c1_23 = arith.constant 1 : index
    %c0_24 = arith.constant 0 : index
    %26 = vector.load %arg5[%c1_23, %c0_24] : memref<9x128xf32, #tpu.memory_space<vmem>>, vector<1x128xf32>
    %c0_25 = arith.constant 0 : index
    %c1_26 = arith.constant 1 : index
    %c0_27 = arith.constant 0 : index
    %27 = vector.load %arg12[%c0_25, %c1_26, %c0_27] : memref<18x18x128xf32, #tpu.memory_space<vmem>>, vector<16x16x128xf32>
    %28 = vector.shape_cast %26 : vector<1x128xf32> to vector<1x1x128xf32>
    %29 = vector.broadcast %28 : vector<1x1x128xf32> to vector<16x16x128xf32>
    %30 = arith.mulf %27, %29 : vector<16x16x128xf32>
    %31 = arith.addf %25, %30 : vector<16x16x128xf32>
    %c2 = arith.constant 2 : index
    %c0_28 = arith.constant 0 : index
    %32 = vector.load %arg5[%c2, %c0_28] : memref<9x128xf32, #tpu.memory_space<vmem>>, vector<1x128xf32>
    %c0_29 = arith.constant 0 : index
    %c2_30 = arith.constant 2 : index
    %c0_31 = arith.constant 0 : index
    %33 = vector.load %arg12[%c0_29, %c2_30, %c0_31] : memref<18x18x128xf32, #tpu.memory_space<vmem>>, vector<16x16x128xf32>
    %34 = vector.shape_cast %32 : vector<1x128xf32> to vector<1x1x128xf32>
    %35 = vector.broadcast %34 : vector<1x1x128xf32> to vector<16x16x128xf32>
    %36 = arith.mulf %33, %35 : vector<16x16x128xf32>
    %37 = arith.addf %31, %36 : vector<16x16x128xf32>
    %c3 = arith.constant 3 : index
    %c0_32 = arith.constant 0 : index
    %38 = vector.load %arg5[%c3, %c0_32] : memref<9x128xf32, #tpu.memory_space<vmem>>, vector<1x128xf32>
    %c1_33 = arith.constant 1 : index
    %c0_34 = arith.constant 0 : index
    %c0_35 = arith.constant 0 : index
    %39 = vector.load %arg12[%c1_33, %c0_34, %c0_35] : memref<18x18x128xf32, #tpu.memory_space<vmem>>, vector<16x16x128xf32>
    %40 = vector.shape_cast %38 : vector<1x128xf32> to vector<1x1x128xf32>
    %41 = vector.broadcast %40 : vector<1x1x128xf32> to vector<16x16x128xf32>
    %42 = arith.mulf %39, %41 : vector<16x16x128xf32>
    %43 = arith.addf %37, %42 : vector<16x16x128xf32>
    %c4 = arith.constant 4 : index
    %c0_36 = arith.constant 0 : index
    %44 = vector.load %arg5[%c4, %c0_36] : memref<9x128xf32, #tpu.memory_space<vmem>>, vector<1x128xf32>
    %c1_37 = arith.constant 1 : index
    %c1_38 = arith.constant 1 : index
    %c0_39 = arith.constant 0 : index
    %45 = vector.load %arg12[%c1_37, %c1_38, %c0_39] : memref<18x18x128xf32, #tpu.memory_space<vmem>>, vector<16x16x128xf32>
    %46 = vector.shape_cast %44 : vector<1x128xf32> to vector<1x1x128xf32>
    %47 = vector.broadcast %46 : vector<1x1x128xf32> to vector<16x16x128xf32>
    %48 = arith.mulf %45, %47 : vector<16x16x128xf32>
    %49 = arith.addf %43, %48 : vector<16x16x128xf32>
    %c5 = arith.constant 5 : index
    %c0_40 = arith.constant 0 : index
    %50 = vector.load %arg5[%c5, %c0_40] : memref<9x128xf32, #tpu.memory_space<vmem>>, vector<1x128xf32>
    %c1_41 = arith.constant 1 : index
    %c2_42 = arith.constant 2 : index
    %c0_43 = arith.constant 0 : index
    %51 = vector.load %arg12[%c1_41, %c2_42, %c0_43] : memref<18x18x128xf32, #tpu.memory_space<vmem>>, vector<16x16x128xf32>
    %52 = vector.shape_cast %50 : vector<1x128xf32> to vector<1x1x128xf32>
    %53 = vector.broadcast %52 : vector<1x1x128xf32> to vector<16x16x128xf32>
    %54 = arith.mulf %51, %53 : vector<16x16x128xf32>
    %55 = arith.addf %49, %54 : vector<16x16x128xf32>
    %c6 = arith.constant 6 : index
    %c0_44 = arith.constant 0 : index
    %56 = vector.load %arg5[%c6, %c0_44] : memref<9x128xf32, #tpu.memory_space<vmem>>, vector<1x128xf32>
    %c2_45 = arith.constant 2 : index
    %c0_46 = arith.constant 0 : index
    %c0_47 = arith.constant 0 : index
    %57 = vector.load %arg12[%c2_45, %c0_46, %c0_47] : memref<18x18x128xf32, #tpu.memory_space<vmem>>, vector<16x16x128xf32>
    %58 = vector.shape_cast %56 : vector<1x128xf32> to vector<1x1x128xf32>
    %59 = vector.broadcast %58 : vector<1x1x128xf32> to vector<16x16x128xf32>
    %60 = arith.mulf %57, %59 : vector<16x16x128xf32>
    %61 = arith.addf %55, %60 : vector<16x16x128xf32>
    %c7 = arith.constant 7 : index
    %c0_48 = arith.constant 0 : index
    %62 = vector.load %arg5[%c7, %c0_48] : memref<9x128xf32, #tpu.memory_space<vmem>>, vector<1x128xf32>
    %c2_49 = arith.constant 2 : index
    %c1_50 = arith.constant 1 : index
    %c0_51 = arith.constant 0 : index
    %63 = vector.load %arg12[%c2_49, %c1_50, %c0_51] : memref<18x18x128xf32, #tpu.memory_space<vmem>>, vector<16x16x128xf32>
    %64 = vector.shape_cast %62 : vector<1x128xf32> to vector<1x1x128xf32>
    %65 = vector.broadcast %64 : vector<1x1x128xf32> to vector<16x16x128xf32>
    %66 = arith.mulf %63, %65 : vector<16x16x128xf32>
    %67 = arith.addf %61, %66 : vector<16x16x128xf32>
    %c8 = arith.constant 8 : index
    %c0_52 = arith.constant 0 : index
    %68 = vector.load %arg5[%c8, %c0_52] : memref<9x128xf32, #tpu.memory_space<vmem>>, vector<1x128xf32>
    %c2_53 = arith.constant 2 : index
    %c2_54 = arith.constant 2 : index
    %c0_55 = arith.constant 0 : index
    %69 = vector.load %arg12[%c2_53, %c2_54, %c0_55] : memref<18x18x128xf32, #tpu.memory_space<vmem>>, vector<16x16x128xf32>
    %70 = vector.shape_cast %68 : vector<1x128xf32> to vector<1x1x128xf32>
    %71 = vector.broadcast %70 : vector<1x1x128xf32> to vector<16x16x128xf32>
    %72 = arith.mulf %69, %71 : vector<16x16x128xf32>
    %73 = arith.addf %67, %72 : vector<16x16x128xf32>
    %c0_56 = arith.constant 0 : index
    %c0_57 = arith.constant 0 : index
    %74 = vector.load %arg6[%c0_56, %c0_57] : memref<1x128xf32, #tpu.memory_space<vmem>>, vector<1x128xf32>
    %75 = vector.shape_cast %74 : vector<1x128xf32> to vector<1x1x128xf32>
    %76 = vector.broadcast %75 : vector<1x1x128xf32> to vector<16x16x128xf32>
    %77 = arith.mulf %73, %76 : vector<16x16x128xf32>
    %c0_58 = arith.constant 0 : index
    %c0_59 = arith.constant 0 : index
    %78 = vector.load %arg7[%c0_58, %c0_59] : memref<1x128xf32, #tpu.memory_space<vmem>>, vector<1x128xf32>
    %79 = vector.shape_cast %78 : vector<1x128xf32> to vector<1x1x128xf32>
    %80 = vector.broadcast %79 : vector<1x1x128xf32> to vector<16x16x128xf32>
    %81 = arith.addf %77, %80 : vector<16x16x128xf32>
    %cst_60 = arith.constant 0.000000e+00 : f32
    %cst_61 = arith.constant 6.000000e+00 : f32
    %82 = vector.broadcast %cst_60 : f32 to vector<16x16x128xf32>
    %83 = arith.maximumf %82, %81 : vector<16x16x128xf32>
    %84 = vector.broadcast %cst_61 : f32 to vector<16x16x128xf32>
    %85 = arith.minimumf %84, %83 : vector<16x16x128xf32>
    %86 = vector.shape_cast %85 : vector<16x16x128xf32> to vector<256x128xf32>
    %c0_62 = arith.constant 0 : index
    %c0_63 = arith.constant 0 : index
    %87 = vector.load %arg8[%c0_62, %c0_63] : memref<128x128xf32, #tpu.memory_space<vmem>>, vector<128x128xf32>
    %cst_64 = arith.constant dense<0.000000e+00> : vector<256x128xf32>
    %88 = tpu.matmul %86, %87, %cst_64 {dimension_numbers = #tpu.dot_dimension_numbers<[1], [0], [0], [1], [0, 0, 1, 1], [], []>} : vector<256x128xf32>, vector<128x128xf32>, vector<256x128xf32> -> vector<256x128xf32>
    %c0_65 = arith.constant 0 : index
    %c0_66 = arith.constant 0 : index
    %89 = vector.load %arg9[%c0_65, %c0_66] : memref<1x128xf32, #tpu.memory_space<vmem>>, vector<1x128xf32>
    %90 = vector.broadcast %89 : vector<1x128xf32> to vector<256x128xf32>
    %91 = arith.mulf %88, %90 : vector<256x128xf32>
    %c0_67 = arith.constant 0 : index
    %c0_68 = arith.constant 0 : index
    %92 = vector.load %arg10[%c0_67, %c0_68] : memref<1x128xf32, #tpu.memory_space<vmem>>, vector<1x128xf32>
    %93 = vector.broadcast %92 : vector<1x128xf32> to vector<256x128xf32>
    %94 = arith.addf %91, %93 : vector<256x128xf32>
    %95 = arith.addf %94, %4 : vector<256x128xf32>
    %96 = vector.shape_cast %95 : vector<256x128xf32> to vector<16x16x128xf32>
    %c0_69 = arith.constant 0 : index
    %c0_70 = arith.constant 0 : index
    %c0_71 = arith.constant 0 : index
    %c0_72 = arith.constant 0 : index
    %97 = vector.load %arg11[%c0_69, %c0_70, %c0_71, %c0_72] : memref<1x16x16x128xf32, #tpu.memory_space<vmem>>, vector<1x16x16x128xf32>
    %98 = vector.shape_cast %97 : vector<1x16x16x128xf32> to vector<16x16x128xf32>
    %99 = vector.shape_cast %96 : vector<16x16x128xf32> to vector<1x16x16x128xf32>
    tpu.vector_store %arg11[%c0_69, %c0_70, %c0_71, %c0_72], %99 {strides = array<i32>} : memref<1x16x16x128xf32, #tpu.memory_space<vmem>>, vector<1x16x16x128xf32>,
    return
  }
  func.func @transform_0(%arg0: i32) -> (i32, i32, i32, i32) {
    %c0_i32 = arith.constant 0 : i32
    %c0_i32_0 = arith.constant 0 : i32
    %c0_i32_1 = arith.constant 0 : i32
    %c0_i32_2 = arith.constant 0 : i32
    return %arg0, %c0_i32, %c0_i32_0, %c0_i32_1 : i32, i32, i32, i32
  }
  func.func @transform_1(%arg0: i32) -> (i32, i32) {
    %c0_i32 = arith.constant 0 : i32
    %c0_i32_0 = arith.constant 0 : i32
    %c0_i32_1 = arith.constant 0 : i32
    return %c0_i32, %c0_i32_0 : i32, i32
  }
  func.func @transform_2(%arg0: i32) -> (i32, i32) {
    %c0_i32 = arith.constant 0 : i32
    %c0_i32_0 = arith.constant 0 : i32
    %c0_i32_1 = arith.constant 0 : i32
    return %c0_i32, %c0_i32_0 : i32, i32
  }
  func.func @transform_3(%arg0: i32) -> (i32, i32) {
    %c0_i32 = arith.constant 0 : i32
    %c0_i32_0 = arith.constant 0 : i32
    %c0_i32_1 = arith.constant 0 : i32
    return %c0_i32, %c0_i32_0 : i32, i32
  }
  func.func @transform_4(%arg0: i32) -> (i32, i32) {
    %c0_i32 = arith.constant 0 : i32
    %c0_i32_0 = arith.constant 0 : i32
    %c0_i32_1 = arith.constant 0 : i32
    return %c0_i32, %c0_i32_0 : i32, i32
  }
  func.func @transform_5(%arg0: i32) -> (i32, i32) {
    %c0_i32 = arith.constant 0 : i32
    %c0_i32_0 = arith.constant 0 : i32
    %c0_i32_1 = arith.constant 0 : i32
    return %c0_i32, %c0_i32_0 : i32, i32
  }
  func.func @transform_6(%arg0: i32) -> (i32, i32) {
    %c0_i32 = arith.constant 0 : i32
    %c0_i32_0 = arith.constant 0 : i32
    %c0_i32_1 = arith.constant 0 : i32
    return %c0_i32, %c0_i32_0 : i32, i32
  }
  func.func @transform_7(%arg0: i32) -> (i32, i32) {
    %c0_i32 = arith.constant 0 : i32
    %c0_i32_0 = arith.constant 0 : i32
    %c0_i32_1 = arith.constant 0 : i32
    return %c0_i32, %c0_i32_0 : i32, i32
  }
  func.func @transform_8(%arg0: i32) -> (i32, i32) {
    %c0_i32 = arith.constant 0 : i32
    %c0_i32_0 = arith.constant 0 : i32
    %c0_i32_1 = arith.constant 0 : i32
    return %c0_i32, %c0_i32_0 : i32, i32
  }
  func.func @transform_9(%arg0: i32) -> (i32, i32) {
    %c0_i32 = arith.constant 0 : i32
    %c0_i32_0 = arith.constant 0 : i32
    %c0_i32_1 = arith.constant 0 : i32
    return %c0_i32, %c0_i32_0 : i32, i32
  }
  func.func @transform_10(%arg0: i32) -> (i32, i32, i32, i32) {
    %c0_i32 = arith.constant 0 : i32
    %c0_i32_0 = arith.constant 0 : i32
    %c0_i32_1 = arith.constant 0 : i32
    %c0_i32_2 = arith.constant 0 : i32
    return %arg0, %c0_i32, %c0_i32_0, %c0_i32_1 : i32, i32, i32, i32
  }
}

</mosaic_0001>

<bundles_post_ra>
// kernel: inverted_residual_forward.1
= control target key start
LH: loop header
LB: loop body
LE: loop exit
PB: predicated region body
PF: predicated region fallthrough
CT: control target
= control target key end

     0   :  { %s2262_s13 = smov 0   ;;  %s3497_s0 = inlined_call_operand.vmem [shape: f32[2,16,16,128], index: 0, kind: input, shape index: {}]   ;;  %s3498_s1 = inlined_call_operand.vmem [shape: f32[128,128], index: 1, kind: input, shape index: {}]   ;;  %s3499_s2 = inlined_call_operand.vmem [shape: f32[1,128], index: 2, kind: input, shape index: {}]   ;;  %s3500_s3 = inlined_call_operand.vmem [shape: f32[1,128], index: 3, kind: input, shape index: {}]   ;;  %s3501_s4 = inlined_call_operand.vmem [shape: f32[9,128], index: 4, kind: input, shape index: {}]   ;;  %s3502_s5 = inlined_call_operand.vmem [shape: f32[1,128], index: 5, kind: input, shape index: {}]   ;;  %s3503_s6 = inlined_call_operand.vmem [shape: f32[1,128], index: 6, kind: input, shape index: {}]   ;;  %s3504_s7 = inlined_call_operand.vmem [shape: f32[128,128], index: 7, kind: input, shape index: {}]   ;;  %s3505_s8 = inlined_call_operand.vmem [shape: f32[1,128], index: 8, kind: input, shape index: {}]   ;;  %s3506_s9 = inlined_call_operand.vmem [shape: f32[1,128], index: 9, kind: input, shape index: {}]   ;;  %s3507_s10 = inlined_call_operand.vmem [shape: f32[2,16,16,128], index: 10, kind: output, shape index: {}]  }
   0x1 LB: > { %s2083_s14 = sadd.s32 4294967295, %s2204_s13   ;;  %p2087_p0 = scmp.ge.s32.totalorder %s2204_s13, 1  ;;  %s2204_s13 = sphi %s2262_s13, %s20_s13  }
   0x2   : > { %p312_p1 = scmp.lt.s32.totalorder %s2204_s13, 3 }
   0x4   : > { %p313_p2 = pnand %p2087_p0, %p312_p1 }
   0x6   : > { %316 = sbr.rel (%p313_p2) target bundleno = 588 (0x24c), region = 60 }
   0xb   : > { %v461_v0 = vld [vmem:[%s3498_s1 + $0x78] sm:$0xff]  ;;  %v460_v1 = vld [vmem:[%s3498_s1 + $0x70] sm:$0xff]  ;;  %v459_v2 = vld [vmem:[%s3498_s1 + $0x68] sm:$0xff]  ;;  %p350_p3 = scmp.lt.s32.totalorder %s2083_s14, 1  ;;  %v2206_v35 = vmov 0.0  }
   0xc   : > { %462 = vmatpush.msra.mxu0 %v461_v0  ;;  %2096 = vmatpush.msra.mxu2 %v461_v0  ;;  %v458_v3 = vld [vmem:[%s3498_s1 + $0x60] sm:$0xff]  ;;  %v457_v4 = vld [vmem:[%s3498_s1 + $0x58] sm:$0xff]  ;;  %v456_v5 = vld [vmem:[%s3498_s1 + $0x50] sm:$0xff]  ;;  %363 = vst [vmem:[#allocation2 + $0x18] sm:$0xff] %v2206_v35 }
   0xd   : > { %v455_v6 = vld [vmem:[%s3498_s1 + $0x48] sm:$0xff]  ;;  %v454_v7 = vld [vmem:[%s3498_s1 + $0x40] sm:$0xff]  ;;  %v453_v8 = vld [vmem:[%s3498_s1 + $0x38] sm:$0xff]  ;;  %s3544_s14 = smov (!%p350_p3, %s2083_s14), 1  ;;  %364 = vst [vmem:[#allocation2 + $0x20] sm:$0xff] %v2206_v35 }
   0xe   : > { %463 = vmatpush.msra.mxu0 %v460_v1  ;;  %2097 = vmatpush.msra.mxu2 %v460_v1  ;;  %v452_v9 = vld [vmem:[%s3498_s1 + $0x30] sm:$0xff]  ;;  %v451_v10 = vld [vmem:[%s3498_s1 + $0x28] sm:$0xff]  ;;  %v450_v11 = vld [vmem:[%s3498_s1 + $0x20] sm:$0xff]  ;;  %s2094_s23 = sshll.u32 %s3544_s14, 8  ;;  %360 = vst [vmem:[#allocation2] sm:$0xff] %v2206_v35 }
   0xf   : > { %v449_v12 = vld [vmem:[%s3498_s1 + $0x18] sm:$0xff]  ;;  %v448_v13 = vld [vmem:[%s3498_s1 + $0x10] sm:$0xff]  ;;  %v447_v14 = vld [vmem:[%s3498_s1 + $0x8] sm:$0xff]  ;;  %s2327_s30 = scalar_lea.vmem %s3497_s0, %s2094_s23  ;;  %361 = vst [vmem:[#allocation2 + $0x8] sm:$0xff] %v2206_v35  ;;  %s3220_s26 = scalar_lea.vmem %s3507_s10, %s2094_s23 }
  0x10   : > { %464 = vmatpush.msra.mxu0 %v459_v2  ;;  %2098 = vmatpush.msra.mxu2 %v459_v2  ;;  %v446_v15 = vld [vmem:[%s3498_s1] sm:$0xff]  ;;  %v415_v17 = vld [vmem:[%s2327_s30 + $0x8] sm:$0xff]  ;;  %v416_v18 = vld [vmem:[%s2327_s30 + $0x10] sm:$0xff]  ;;  %362 = vst [vmem:[#allocation2 + $0x10] sm:$0x3] %v2206_v35 }
  0x11   : > { %v414_v16 = vld [vmem:[%s2327_s30] sm:$0xff]  ;;  %v417_v19 = vld [vmem:[%s2327_s30 + $0x18] sm:$0xff]  ;;  %v419_v21 = vld [vmem:[%s2327_s30 + $0x28] sm:$0xff]  ;;  %365 = vst [vmem:[#allocation2 + $0x28] sm:$0x3] %v2206_v35 }
  0x12   : > { %465 = vmatpush.msra.mxu0 %v458_v3  ;;  %2099 = vmatpush.msra.mxu2 %v458_v3  ;;  %v418_v20 = vld [vmem:[%s2327_s30 + $0x20] sm:$0xff]  ;;  %v420_v23 = vld [vmem:[%s2327_s30 + $0x30] sm:$0xff]  ;;  %v431_v24 = vld [vmem:[%s2327_s30 + $0x88] sm:$0xff]  ;;  %366 = vst [vmem:[#allocation2 + $0x30] sm:$0xff] %v2206_v35 }
  0x13   : > { %v430_v22 = vld [vmem:[%s2327_s30 + $0x80] sm:$0xff]  ;;  %v421_v25 = vld [vmem:[%s2327_s30 + $0x38] sm:$0xff]  ;;  %v432_v26 = vld [vmem:[%s2327_s30 + $0x90] sm:$0xff]  ;;  %367 = vst [vmem:[#allocation2 + $0x38] sm:$0xff] %v2206_v35 }
  0x14   : > { %466 = vmatpush.msra.mxu0 %v457_v4  ;;  %2100 = vmatpush.msra.mxu2 %v457_v4  ;;  %v422_v27 = vld [vmem:[%s2327_s30 + $0x40] sm:$0xff]  ;;  %v433_v28 = vld [vmem:[%s2327_s30 + $0x98] sm:$0xff]  ;;  %v423_v29 = vld [vmem:[%s2327_s30 + $0x48] sm:$0xff]  ;;  %368 = vst [vmem:[#allocation2 + $0x40] sm:$0x3] %v2206_v35 }
  0x15   : > { %v434_v30 = vld [vmem:[%s2327_s30 + $0xa0] sm:$0xff]  ;;  %v424_v31 = vld [vmem:[%s2327_s30 + $0x50] sm:$0xff]  ;;  %v435_v32 = vld [vmem:[%s2327_s30 + $0xa8] sm:$0xff]  ;;  %369 = vst [vmem:[#allocation2 + $0x48] sm:$0xff] %v2206_v35 }
  0x16   : > { %467 = vmatpush.msra.mxu0 %v456_v5  ;;  %2101 = vmatpush.msra.mxu2 %v456_v5  ;;  %v425_v33 = vld [vmem:[%s2327_s30 + $0x58] sm:$0xff]  ;;  %v436_v34 = vld [vmem:[%s2327_s30 + $0xb0] sm:$0xff]  ;;  %v426_v36 = vld [vmem:[%s2327_s30 + $0x60] sm:$0xff]  ;;  %370 = vst [vmem:[#allocation2 + $0x50] sm:$0xff] %v2206_v35 }
  0x17   : > { %v437_v37 = vld [vmem:[%s2327_s30 + $0xb8] sm:$0xff]  ;;  %371 = vst [vmem:[#allocation2 + $0x58] sm:$0x3] %v2206_v35  ;;  %v427_v38 = vld [vmem:[%s2327_s30 + $0x68] sm:$0xff]  ;;  %v438_v39 = vld [vmem:[%s2327_s30 + $0xc0] sm:$0xff] }
  0x18   : > { %468 = vmatpush.msra.mxu0 %v455_v6  ;;  %2102 = vmatpush.msra.mxu2 %v455_v6  ;;  %372 = vst [vmem:[#allocation2 + $0x60] sm:$0xff] %v2206_v35  ;;  %v428_v40 = vld [vmem:[%s2327_s30 + $0x70] sm:$0xff]  ;;  %v439_v41 = vld [vmem:[%s2327_s30 + $0xc8] sm:$0xff]  ;;  %v1778_v42 = vld [vmem:[%s3504_s7 + $0x78] sm:$0xff] }
  0x19   : > { %373 = vst [vmem:[#allocation2 + $0x68] sm:$0xff] %v2206_v35  ;;  %v429_v43 = vld [vmem:[%s2327_s30 + $0x78] sm:$0xff]  ;;  %1779 = vmatpush.msra.mxu1 %v1778_v42  ;;  %2112 = vmatpush.msra.mxu3 %v1778_v42  ;;  %v1777_v44 = vld [vmem:[%s3504_s7 + $0x70] sm:$0xff]  ;;  %v1776_v45 = vld [vmem:[%s3504_s7 + $0x68] sm:$0xff] }
  0x1a   : > { %469 = vmatpush.msra.mxu0 %v454_v7  ;;  %2103 = vmatpush.msra.mxu2 %v454_v7  ;;  %374 = vst [vmem:[#allocation2 + $0x70] sm:$0x3] %v2206_v35  ;;  %v440_v46 = vld [vmem:[%s2327_s30 + $0xd0] sm:$0xff]  ;;  %v2404_v47 = vld [vmem:[%s3499_s2] ss:$0 sm:$0xff]  ;;  %v1774_v50 = vld [vmem:[%s3504_s7 + $0x58] sm:$0xff] }
  0x1b   : > { %375 = vst [vmem:[#allocation2 + $0x78] sm:$0xff] %v2206_v35  ;;  %1780 = vmatpush.msra.mxu1 %v1777_v44  ;;  %2113 = vmatpush.msra.mxu3 %v1777_v44  ;;  %v1775_v48 = vld [vmem:[%s3504_s7 + $0x60] sm:$0xff]  ;;  %v1773_v53 = vld [vmem:[%s3504_s7 + $0x50] sm:$0xff]  ;;  %v1772_v55 = vld [vmem:[%s3504_s7 + $0x48] sm:$0xff] }
  0x1c   : > { %470 = vmatpush.msra.mxu0 %v453_v8  ;;  %2104 = vmatpush.msra.mxu2 %v453_v8  ;;  %376 = vst [vmem:[#allocation2 + $0x80] sm:$0xff] %v2206_v35  ;;  %v2414_v49 = vld [vmem:[%s3500_s3] ss:$0 sm:$0xff]  ;;  %v441_v56 = vld [vmem:[%s2327_s30 + $0xd8] sm:$0xff]  ;;  %v1769_v63 = vld [vmem:[%s3504_s7 + $0x30] sm:$0xff] }
  0x1d   : > { %377 = vst [vmem:[#allocation2 + $0x88] sm:$0x3] %v2206_v35  ;;  %1781 = vmatpush.msra.mxu1 %v1776_v45  ;;  %2114 = vmatpush.msra.mxu3 %v1776_v45  ;;  %v1771_v58 = vld [vmem:[%s3504_s7 + $0x40] sm:$0xff]  ;;  %v1770_v60 = vld [vmem:[%s3504_s7 + $0x38] sm:$0xff]  ;;  %v1768_v1 = vld [vmem:[%s3504_s7 + $0x28] sm:$0xff] }
  0x1e   : > { %471 = vmatpush.msra.mxu0 %v452_v9  ;;  %2105 = vmatpush.msra.mxu2 %v452_v9  ;;  %378 = vst [vmem:[#allocation2 + $0x90] sm:$0xff] %v2206_v35  ;;  %v442_v2 = vld [vmem:[%s2327_s30 + $0xe0] sm:$0xff]  ;;  %v1766_v8 = vld [vmem:[%s3504_s7 + $0x18] sm:$0xff] }
  0x1f   : > { %379 = vst [vmem:[#allocation2 + $0x98] sm:$0xff] %v2206_v35  ;;  %1782 = vmatpush.msra.mxu1 %v1775_v48  ;;  %2115 = vmatpush.msra.mxu3 %v1775_v48  ;;  %v1767_v4 = vld [vmem:[%s3504_s7 + $0x20] sm:$0xff] }
  0x20   : > { %472 = vmatpush.msra.mxu0 %v451_v10  ;;  %2106 = vmatpush.msra.mxu2 %v451_v10  ;;  %380 = vst [vmem:[#allocation2 + $0xa0] sm:$0x3] %v2206_v35  ;;  %v2466_v5 = vld [vmem:[%s3501_s4] ss:$0 sm:$0xff]  ;;  %v843_v6 = vld [vmem:[#allocation2 + $0x1] sm:$0xff] }
  0x21   : > { %381 = vst [vmem:[#allocation2 + $0xa8] sm:$0xff] %v2206_v35  ;;  %1783 = vmatpush.msra.mxu1 %v1774_v50  ;;  %2116 = vmatpush.msra.mxu3 %v1774_v50  ;;  %v2478_v9 = vld [vmem:[%s3501_s4 + $0x1] ss:$0 sm:$0xff] }
  0x22   : > { %473 = vmatpush.msra.mxu0 %v450_v11  ;;  %2107 = vmatpush.msra.mxu2 %v450_v11  ;;  %382 = vst [vmem:[#allocation2 + $0xb0] sm:$0xff] %v2206_v35 }
  0x23   : > { %383 = vst [vmem:[#allocation2 + $0xb8] sm:$0x3] %v2206_v35  ;;  %1784 = vmatpush.msra.mxu1 %v1773_v53  ;;  %2117 = vmatpush.msra.mxu3 %v1773_v53 }
  0x24   : > { %474 = vmatpush.msra.mxu0 %v449_v12  ;;  %2108 = vmatpush.msra.mxu2 %v449_v12  ;;  %384 = vst [vmem:[#allocation2 + $0xc0] sm:$0xff] %v2206_v35  ;;  %v1765_v12 = vld [vmem:[%s3504_s7 + $0x10] sm:$0xff] }
  0x25   : > { %385 = vst [vmem:[#allocation2 + $0xc8] sm:$0xff] %v2206_v35  ;;  %1785 = vmatpush.msra.mxu1 %v1772_v55  ;;  %2118 = vmatpush.msra.mxu3 %v1772_v55 }
  0x26   : > { %475 = vmatpush.msra.mxu0 %v448_v13  ;;  %2109 = vmatpush.msra.mxu2 %v448_v13  ;;  %386 = vst [vmem:[#allocation2 + $0xd0] sm:$0x3] %v2206_v35  ;;  %v778_v13 = vmul.f32 0.0, %v2466_v5 }
  0x27   : > { %387 = vst [vmem:[#allocation2 + $0xd8] sm:$0xff] %v2206_v35  ;;  %1786 = vmatpush.msra.mxu1 %v1771_v58  ;;  %2119 = vmatpush.msra.mxu3 %v1771_v58 }
  0x28   : > { %476 = vmatpush.msra.mxu0 %v447_v14  ;;  %2110 = vmatpush.msra.mxu2 %v447_v14  ;;  %388 = vst [vmem:[#allocation2 + $0xe0] sm:$0xff] %v2206_v35  ;;  %v876_v14 = vmul.f32 %v2478_v9, %v843_v6  ;;  %v2558_v6 = vld [vmem:[%s3501_s4 + $0x8] ss:$0 sm:$0xff] }
  0x29   : > { %389 = vst [vmem:[#allocation2 + $0xe8] sm:$0x3] %v2206_v35  ;;  %1787 = vmatpush.msra.mxu1 %v1770_v60  ;;  %2120 = vmatpush.msra.mxu3 %v1770_v60 }
  0x2a   : > { %477 = vmatpush.msra.mxu0 %v446_v15  ;;  %2111 = vmatpush.msra.mxu2 %v446_v15  ;;  %390 = vst [vmem:[#allocation2 + $0xf0] sm:$0xff] %v2206_v35  ;;  %v2491_v15 = vld [vmem:[%s3501_s4 + $0x2] ss:$0 sm:$0xff] }
  0x2b   : > { %478 = vmatmul.f32.vlgmr.msra.gmra.mxu0 %v414_v16  ;;  %526 = vmatmul.f32.vlgmr.msra.gmra.mxu2 %v430_v22  ;;  %391 = vst [vmem:[#allocation2 + $0xf8] sm:$0xff] %v2206_v35  ;;  %v844_v16 = vld [vmem:[#allocation2 + $0x9] sm:$0xff] }
  0x2c   : > { %392 = vst [vmem:[#allocation2 + $0x100] sm:$0x3] %v2206_v35  ;;  %1788 = vmatpush.msra.mxu1 %v1769_v63  ;;  %2121 = vmatpush.msra.mxu3 %v1769_v63 }
  0x2d   : > { %393 = vst [vmem:[#allocation2 + $0x108] sm:$0xff] %v2206_v35 }
  0x2e   : > { %394 = vst [vmem:[#allocation2 + $0x110] sm:$0xff] %v2206_v35  ;;  %1789 = vmatpush.msra.mxu1 %v1768_v1  ;;  %2122 = vmatpush.msra.mxu3 %v1768_v1  ;;  %v445_v1 = vld [vmem:[%s2327_s30 + $0xf8] sm:$0xff] }
  0x2f   : > { %395 = vst [vmem:[#allocation2 + $0x118] sm:$0x3] %v2206_v35 }
  0x30   : > { %396 = vst [vmem:[#allocation2 + $0x120] sm:$0xff] %v2206_v35  ;;  %1790 = vmatpush.msra.mxu1 %v1767_v4  ;;  %2123 = vmatpush.msra.mxu3 %v1767_v4 }
  0x31   : > { %397 = vst [vmem:[#allocation2 + $0x128] sm:$0xff] %v2206_v35 }
  0x32   : > { %398 = vst [vmem:[#allocation2 + $0x130] sm:$0x3] %v2206_v35  ;;  %1791 = vmatpush.msra.mxu1 %v1766_v8  ;;  %2124 = vmatpush.msra.mxu3 %v1766_v8 }
  0x33   : > { %481 = vmatmul.f32.gmra.mxu0 %v415_v17  ;;  %529 = vmatmul.f32.gmra.mxu2 %v431_v24  ;;  %399 = vst [vmem:[#allocation2 + $0x138] sm:$0xff] %v2206_v35  ;;  %v941_v17 = vld [vmem:[#allocation2 + $0x2] sm:$0xff]  ;;  %v908_v24 = vadd.f32 %v876_v14, %v778_v13 }
  0x34   : > { %400 = vst [vmem:[#allocation2 + $0x140] sm:$0xff] %v2206_v35  ;;  %1792 = vmatpush.msra.mxu1 %v1765_v12  ;;  %2125 = vmatpush.msra.mxu3 %v1765_v12 }
  0x35   : > { %401 = vst [vmem:[#allocation2 + $0x148] sm:$0x3] %v2206_v35 }
  0x36   : > { %402 = vst [vmem:[#allocation2 + $0x150] sm:$0xff] %v2206_v35 }
  0x37   : > { %403 = vst [vmem:[#allocation2 + $0x158] sm:$0xff] %v2206_v35 }
  0x38   : > { %404 = vst [vmem:[#allocation2 + $0x160] sm:$0x3] %v2206_v35 }
  0x39   : > { %405 = vst [vmem:[#allocation2 + $0x168] sm:$0xff] %v2206_v35 }
  0x3a   : > { %406 = vst [vmem:[#allocation2 + $0x170] sm:$0xff] %v2206_v35 }
  0x3b   : > { %484 = vmatmul.f32.gmra.mxu0 %v416_v18  ;;  %532 = vmatmul.f32.gmra.mxu2 %v432_v26  ;;  %407 = vst [vmem:[#allocation2 + $0x178] sm:$0x3] %v2206_v35  ;;  %v2508_v26 = vld [vmem:[%s3501_s4 + $0x3] ss:$0 sm:$0xff] }
  0x3c   : > { %408 = vst [vmem:[#allocation2 + $0x180] sm:$0xff] %v2206_v35 }
  0x3d   : > { %409 = vst [vmem:[#allocation2 + $0x188] sm:$0xff] %v2206_v35 }
  0x3e   : > { %410 = vst [vmem:[#allocation2 + $0x190] sm:$0x3] %v2206_v35 }
  0x3f   : > { %411 = vst [vmem:[#allocation2 + $0x198] sm:$0xff] %v2206_v35 }
  0x40   : > { %412 = vst [vmem:[#allocation2 + $0x1a0] sm:$0xff] %v2206_v35 }
  0x41   : > { %413 = vst [vmem:[#allocation2 + $0x1a8] sm:$0x3] %v2206_v35 }
  0x43   : > { %487 = vmatmul.f32.gmra.mxu0 %v417_v19  ;;  %535 = vmatmul.f32.gmra.mxu2 %v433_v28  ;;  %v1764_v19 = vld [vmem:[%s3504_s7 + $0x8] sm:$0xff] }
  0x44   : > { %1793 = vmatpush.msra.mxu1 %v1764_v19  ;;  %2126 = vmatpush.msra.mxu3 %v1764_v19 }
  0x4b   : > { %490 = vmatmul.f32.gmra.mxu0 %v418_v20  ;;  %538 = vmatmul.f32.gmra.mxu2 %v434_v30  ;;  %v443_v20 = vld [vmem:[%s2327_s30 + $0xe8] sm:$0xff] }
  0x53   : > { %493 = vmatmul.f32.gmra.mxu0 %v419_v21  ;;  %541 = vmatmul.f32.gmra.mxu2 %v435_v32  ;;  %v877_v21 = vmul.f32 %v2478_v9, %v844_v16 }
  0x5b   : > { %496 = vmatmul.f32.gmra.mxu0 %v420_v23  ;;  %544 = vmatmul.f32.gmra.mxu2 %v436_v34  ;;  %v1763_v23 = vld [vmem:[%s3504_s7] sm:$0xff] }
  0x5c   : > { %1794 = vmatpush.msra.mxu1 %v1763_v23  ;;  %2127 = vmatpush.msra.mxu3 %v1763_v23 }
  0x63   : > { %499 = vmatmul.f32.gmra.mxu0 %v421_v25  ;;  %547 = vmatmul.f32.gmra.mxu2 %v437_v37  ;;  %v974_v25 = vmul.f32 %v2491_v15, %v941_v17 }
  0x65   : > { %v1006_v34 = vadd.f32 %v974_v25, %v908_v24  ;;  %v2579_v25 = vld [vmem:[%s3502_s5] ss:$0 sm:$0xff] }
  0x6b   : > { %502 = vmatmul.f32.gmra.mxu0 %v422_v27  ;;  %550 = vmatmul.f32.gmra.mxu2 %v438_v39  ;;  %v942_v27 = vld [vmem:[#allocation2 + $0xa] sm:$0xff]  ;;  %v2525_v39 = vld [vmem:[%s3501_s4 + $0x5] ss:$0 sm:$0xff] }
  0x6c   : > { %v975_v32 = vmul.f32 %v2491_v15, %v942_v27 }
  0x73   : > { %505 = vmatmul.f32.gmra.mxu0 %v423_v29  ;;  %553 = vmatmul.f32.gmra.mxu2 %v439_v41  ;;  %v444_v41 = vld [vmem:[%s2327_s30 + $0xf0] sm:$0xff] }
  0x7b   : > { %508 = vmatmul.f32.gmra.mxu0 %v424_v31  ;;  %556 = vmatmul.f32.gmra.mxu2 %v440_v46  ;;  %v909_v31 = vadd.f32 %v877_v21, %v778_v13  ;;  %v2532_v46 = vld [vmem:[%s3501_s4 + $0x6] ss:$0 sm:$0xff] }
  0x7d   : > { %v1007_v42 = vadd.f32 %v975_v32, %v909_v31 }
  0x83   : > { %511 = vmatmul.f32.gmra.mxu0 %v425_v33  ;;  %559 = vmatmul.f32.gmra.mxu2 %v441_v56 }
  0x8b   : > { %514 = vmatmul.f32.gmra.mxu0 %v426_v36  ;;  %562 = vmatmul.f32.gmra.mxu2 %v442_v2 }
  0x93   : > { %517 = vmatmul.f32.gmra.mxu0 %v427_v38  ;;  %565 = vmatmul.f32.gmra.mxu2 %v443_v20  ;;  %v2520_v38 = vld [vmem:[%s3501_s4 + $0x4] ss:$0 sm:$0xff] }
  0x9b   : > { %520 = vmatmul.f32.gmra.mxu0 %v428_v40  ;;  %568 = vmatmul.f32.gmra.mxu2 %v444_v41 }
  0xa3   : > { %523 = vmatmul.f32.gmra.mxu0 %v429_v43  ;;  %571 = vmatmul.f32.gmra.mxu2 %v445_v1 }
  0xa8   : > { %v479_v51 = vpop.f32.mrf.mxu0 }
  0xa9   : > { %v579_v52 = vmul.f32 %v2404_v47, %v479_v51 }
  0xab   : > { %v615_v54 = vadd.f32 %v2414_v49, %v579_v52 }
  0xad   : > { %v647_v57 = vmax.f32 %v615_v54, 0.0 }
  0xaf   : > { %v2439_v59 = vmin.f32 %v647_v57, 6.0 }
  0xb0   : > { %v482_v61 = vpop.f32.mrf.mxu0 }
  0xb1   : > { %712 = vst [vmem:[#allocation2 + $0x19] sm:$0xff] %v2439_v59  ;;  %v580_v62 = vmul.f32 %v2404_v47, %v482_v61  ;;  %v1170_v50 = vmul.f32 %v2520_v38, %v2439_v59 }
  0xb3   : > { %v616_v0 = vadd.f32 %v2414_v49, %v580_v62  ;;  %v2551_v62 = vld [vmem:[%s3501_s4 + $0x7] ss:$0 sm:$0xff] }
  0xb5   : > { %v648_v3 = vmax.f32 %v616_v0, 0.0 }
  0xb7   : > { %v2470_v7 = vmin.f32 %v648_v3, 6.0 }
  0xb8   : > { %v485_v10 = vpop.f32.mrf.mxu0  ;;  %v1039_v28 = vld [vmem:[#allocation2 + $0x18] sm:$0xff] }
  0xb9   : > { %v581_v11 = vmul.f32 %v2404_v47, %v485_v10  ;;  %713 = vst [vmem:[#allocation2 + $0x21] sm:$0xff] %v2470_v7  ;;  %v1072_v35 = vmul.f32 %v2508_v26, %v1039_v28  ;;  %v1171_v58 = vmul.f32 %v2520_v38, %v2470_v7  ;;  %v780_v2 = vmul.f32 %v2466_v5, %v1039_v28 }
  0xba   : > { %v878_v10 = vmul.f32 %v2478_v9, %v2439_v59  ;;  %v879_v59 = vmul.f32 %v2478_v9, %v2470_v7 }
  0xbb   : > { %v617_v18 = vadd.f32 %v2414_v49, %v581_v11  ;;  %v1104_v45 = vadd.f32 %v1072_v35, %v1006_v34 }
  0xbc   : > { %v910_v20 = vadd.f32 %v878_v10, %v780_v2  ;;  %v527_v2 = vpop.f32.mrf.mxu2 }
  0xbd   : > { %v649_v22 = vmax.f32 %v617_v18, 0.0  ;;  %v1202_v56 = vadd.f32 %v1170_v50, %v1104_v45 }
  0xbf   : > { %v2510_v29 = vmin.f32 %v649_v22, 6.0 }
  0xc0   : > { %v488_v30 = vpop.f32.mrf.mxu0  ;;  %v1040_v36 = vld [vmem:[#allocation2 + $0x20] sm:$0xff] }
  0xc1   : > { %714 = vst [vmem:[#allocation2 + $0x31] sm:$0xff] %v2510_v29  ;;  %v582_v33 = vmul.f32 %v2404_v47, %v488_v30  ;;  %v1235_v40 = vld [vmem:[#allocation2 + $0x1a] sm:$0xff]  ;;  %v1073_v43 = vmul.f32 %v2508_v26, %v1040_v36  ;;  %v1236_v63 = vld [vmem:[#allocation2 + $0x22] sm:$0xff]  ;;  %v781_v12 = vmul.f32 %v2466_v5, %v1040_v36  ;;  %v1465_v14 = vmul.f32 %v2551_v62, %v2510_v29 }
  0xc2   : > { %v1268_v51 = vmul.f32 %v2525_v39, %v1235_v40  ;;  %v1269_v8 = vmul.f32 %v2525_v39, %v1236_v63  ;;  %v976_v11 = vmul.f32 %v2491_v15, %v1235_v40  ;;  %v1172_v45 = vmul.f32 %v2520_v38, %v2510_v29 }
  0xc3   : > { %v618_v37 = vadd.f32 %v2414_v49, %v582_v33  ;;  %v1105_v54 = vadd.f32 %v1073_v43, %v1007_v42  ;;  %v911_v31 = vadd.f32 %v879_v59, %v781_v12  ;;  %v2588_v33 = vld [vmem:[%s3503_s6] ss:$0 sm:$0xff]  ;;  %v880_v59 = vmul.f32 %v2478_v9, %v2510_v29 }
  0xc4   : > { %v1300_v61 = vadd.f32 %v1268_v51, %v1202_v56  ;;  %v1008_v30 = vadd.f32 %v976_v11, %v910_v20 }
  0xc5   : > { %v650_v44 = vmax.f32 %v618_v37, 0.0  ;;  %v1203_v0 = vadd.f32 %v1171_v58, %v1105_v54  ;;  %v977_v37 = vmul.f32 %v2491_v15, %v1236_v63 }
  0xc7   : > { %v2534_v48 = vmin.f32 %v650_v44, 6.0  ;;  %v1301_v18 = vadd.f32 %v1269_v8, %v1203_v0  ;;  %v1009_v50 = vadd.f32 %v977_v37, %v911_v31 }
  0xc8   : > { %v491_v52 = vpop.f32.mrf.mxu0  ;;  %v2539_v53 = vld [vmem:[#allocation2 + $0x30] sm:$0xff] }
  0xc9   : > { %715 = vst [vmem:[#allocation2 + $0x39] sm:$0xff] %v2534_v48  ;;  %v583_v55 = vmul.f32 %v2404_v47, %v491_v52  ;;  %v1367_v57 = vmul.f32 %v2532_v46, %v2539_v53  ;;  %v1074_v21 = vmul.f32 %v2508_v26, %v2539_v53  ;;  %v1466_v35 = vmul.f32 %v2551_v62, %v2534_v48 }
  0xcb   : > { %v619_v60 = vadd.f32 %v2414_v49, %v583_v55  ;;  %v1399_v4 = vadd.f32 %v1367_v57, %v1300_v61  ;;  %v1106_v36 = vadd.f32 %v1074_v21, %v1008_v30 }
  0xcd   : > { %v651_v3 = vmax.f32 %v619_v60, 0.0  ;;  %v1497_v23 = vadd.f32 %v1465_v14, %v1399_v4  ;;  %v1204_v57 = vadd.f32 %v1172_v45, %v1106_v36  ;;  %v595_v4 = vmul.f32 %v2404_v47, %v527_v2 }
  0xcf   : > { %v2565_v13 = vmin.f32 %v651_v3, 6.0  ;;  %v1173_v3 = vmul.f32 %v2520_v38, %v2534_v48 }
  0xd0   : > { %v494_v16 = vpop.f32.mrf.mxu0  ;;  %v1530_v17 = vld [vmem:[#allocation2 + $0x32] sm:$0xff]  ;;  %v2582_v28 = vld [vmem:[#allocation2 + $0x3a] sm:$0xff] }
  0xd1   : > { %v1335_v19 = vld [vmem:[#allocation2 + $0x38] sm:$0xff]  ;;  %716 = vst [vmem:[#allocation2 + $0x49] sm:$0xff] %v2565_v13  ;;  %v584_v22 = vmul.f32 %v2404_v47, %v494_v16  ;;  %v1563_v24 = vmul.f32 %v2558_v6, %v1530_v17  ;;  %v1564_v44 = vmul.f32 %v2558_v6, %v2582_v28  ;;  %v1270_v55 = vmul.f32 %v2525_v39, %v1530_v17 }
  0xd2   : > { %v1368_v27 = vmul.f32 %v2532_v46, %v1335_v19  ;;  %v1075_v40 = vmul.f32 %v2508_v26, %v1335_v19  ;;  %v631_v16 = vadd.f32 %v2414_v49, %v595_v4 }
  0xd3   : > { %v620_v7 = vadd.f32 %v2414_v49, %v584_v22  ;;  %v1595_v32 = vadd.f32 %v1563_v24, %v1497_v23  ;;  %v1302_v12 = vadd.f32 %v1270_v55, %v1204_v57  ;;  %v1271_v22 = vmul.f32 %v2525_v39, %v2582_v28 }
  0xd4   : > { %v1400_v34 = vadd.f32 %v1368_v27, %v1301_v18  ;;  %v1107_v60 = vadd.f32 %v1075_v40, %v1009_v50  ;;  %v782_v18 = vmul.f32 %v2466_v5, %v2539_v53  ;;  %v663_v23 = vmax.f32 %v631_v16, 0.0 }
  0xd5   : > { %v652_v41 = vmax.f32 %v620_v7, 0.0  ;;  %v1631_v42 = vmul.f32 %v2579_v25, %v1595_v32  ;;  %v978_v24 = vmul.f32 %v2491_v15, %v1530_v17  ;;  %v783_v27 = vmul.f32 %v2466_v5, %v1335_v19 }
  0xd6   : > { %v1498_v43 = vadd.f32 %v1466_v35, %v1400_v34  ;;  %v1205_v14 = vadd.f32 %v1173_v3, %v1107_v60  ;;  %v1467_v53 = vmul.f32 %v2551_v62, %v2565_v13  ;;  %v881_v7 = vmul.f32 %v2478_v9, %v2534_v48  ;;  %v530_v48 = vpop.f32.mrf.mxu2 }
  0xd7   : > { %v2599_v51 = vmin.f32 %v652_v41, 6.0  ;;  %v1667_v52 = vadd.f32 %v2588_v33, %v1631_v42  ;;  %v2630_v36 = vmin.f32 %v663_v23, 6.0  ;;  %v912_v37 = vadd.f32 %v880_v59, %v782_v18 }
  0xd8   : > { %v1596_v54 = vadd.f32 %v1564_v44, %v1498_v43  ;;  %v497_v56 = vpop.f32.mrf.mxu0  ;;  %v2603_v58 = vld [vmem:[#allocation2 + $0x48] sm:$0xff]  ;;  %v1303_v29 = vadd.f32 %v1271_v22, %v1205_v14  ;;  %v596_v50 = vmul.f32 %v2404_v47, %v530_v48  ;;  %v882_v18 = vmul.f32 %v2478_v9, %v2565_v13 }
  0xd9   : > { %717 = vst [vmem:[#allocation2 + $0x51] sm:$0xff] %v2599_v51  ;;  %v585_v61 = vmul.f32 %v2404_v47, %v497_v56  ;;  %v1699_v63 = vmax.f32 %v1667_v52, 0.0  ;;  %v1369_v1 = vmul.f32 %v2532_v46, %v2603_v58  ;;  %v1076_v17 = vmul.f32 %v2508_v26, %v2603_v58 }
  0xda   : > { %v1632_v0 = vmul.f32 %v2579_v25, %v1596_v54  ;;  %v1468_v43 = vmul.f32 %v2551_v62, %v2599_v51  ;;  %728 = vst [vmem:[#allocation2 + $0xd9] sm:$0xff] %v2630_v36  ;;  %v1010_v45 = vadd.f32 %v978_v24, %v912_v37  ;;  %v913_v52 = vadd.f32 %v881_v7, %v783_v27 }
  0xdb   : > { %v621_v8 = vadd.f32 %v2414_v49, %v585_v61  ;;  %v1731_v10 = vmin.f32 %v1699_v63, 6.0  ;;  %v1401_v21 = vadd.f32 %v1369_v1, %v1302_v12  ;;  %v632_v61 = vadd.f32 %v2414_v49, %v596_v50 }
  0xdc   : > { %v1668_v11 = vadd.f32 %v2588_v33, %v1632_v0  ;;  %v1108_v60 = vadd.f32 %v1076_v17, %v1010_v45  ;;  %v979_v63 = vmul.f32 %v2491_v15, %v2582_v28  ;;  %v784_v24 = vmul.f32 %v2466_v5, %v2603_v58 }
  0xdd   : > { %v653_v20 = vmax.f32 %v621_v8, 0.0  ;;  %1795 = vmatmul.f32.vlgmr.msra.gmra.mxu1 %v1731_v10  ;;  %v1499_v40 = vadd.f32 %v1467_v53, %v1401_v21  ;;  %v1174_v8 = vmul.f32 %v2520_v38, %v2565_v13  ;;  %v883_v45 = vmul.f32 %v2478_v9, %v2599_v51 }
  0xde   : > { %v1700_v31 = vmax.f32 %v1668_v11, 0.0  ;;  %v664_v11 = vmax.f32 %v632_v61, 0.0  ;;  %v1011_v12 = vadd.f32 %v979_v63, %v913_v52 }
  0xdf   : > { %v2624_v30 = vmin.f32 %v653_v20, 6.0  ;;  %v1206_v21 = vadd.f32 %v1174_v8, %v1108_v60 }
  0xe0   : > { %v500_v32 = vpop.f32.mrf.mxu0  ;;  %v1532_v34 = vld [vmem:[#allocation2 + $0x4a] sm:$0xff]  ;;  %v2640_v44 = vld [vmem:[#allocation2 + $0x52] sm:$0xff]  ;;  %v1732_v55 = vmin.f32 %v1700_v31, 6.0  ;;  %v2660_v22 = vmin.f32 %v664_v11, 6.0 }
  0xe1   : > { %v1337_v35 = vld [vmem:[#allocation2 + $0x50] sm:$0xff]  ;;  %718 = vst [vmem:[#allocation2 + $0x61] sm:$0xff] %v2624_v30  ;;  %v586_v19 = vmul.f32 %v2404_v47, %v500_v32  ;;  %v1565_v41 = vmul.f32 %v2558_v6, %v1532_v34  ;;  %v1566_v4 = vmul.f32 %v2558_v6, %v2640_v44  ;;  %v1272_v10 = vmul.f32 %v2525_v39, %v1532_v34  ;;  %v533_v32 = vpop.f32.mrf.mxu2 }
  0xe2   : > { %v1370_v42 = vmul.f32 %v2532_v46, %v1337_v35  ;;  %v1077_v0 = vmul.f32 %v2508_v26, %v1337_v35  ;;  %729 = vst [vmem:[#allocation2 + $0xe1] sm:$0xff] %v2660_v22  ;;  %v597_v37 = vmul.f32 %v2404_v47, %v533_v32  ;;  %v785_v58 = vmul.f32 %v2466_v5, %v1337_v35 }
  0xe3   : > { %v622_v54 = vadd.f32 %v2414_v49, %v586_v19  ;;  %v1597_v56 = vadd.f32 %v1565_v41, %v1499_v40  ;;  %v1304_v13 = vadd.f32 %v1272_v10, %v1206_v21  ;;  %v980_v41 = vmul.f32 %v2491_v15, %v1532_v34 }
  0xe4   : > { %v1402_v57 = vadd.f32 %v1370_v42, %v1303_v29  ;;  %v1109_v23 = vadd.f32 %v1077_v0, %v1011_v12  ;;  %v1175_v29 = vmul.f32 %v2520_v38, %v2599_v51  ;;  %v633_v48 = vadd.f32 %v2414_v49, %v597_v37 }
  0xe5   : > { %v654_v1 = vmax.f32 %v622_v54, 0.0  ;;  %1798 = vmatmul.f32.gmra.mxu1 %v1732_v55  ;;  %v1633_v2 = vmul.f32 %v2579_v25, %v1597_v56  ;;  %v1469_v35 = vmul.f32 %v2551_v62, %v2624_v30  ;;  %v1273_v54 = vmul.f32 %v2525_v39, %v2640_v44 }
  0xe6   : > { %v1500_v3 = vadd.f32 %v1468_v43, %v1402_v57  ;;  %v1207_v42 = vadd.f32 %v1175_v29, %v1109_v23  ;;  %v914_v43 = vadd.f32 %v882_v18, %v784_v24  ;;  %v665_v55 = vmax.f32 %v633_v48, 0.0 }
  0xe7   : > { %v2655_v14 = vmin.f32 %v654_v1, 6.0  ;;  %v1669_v28 = vadd.f32 %v2588_v33, %v1633_v2  ;;  %v1176_v34 = vmul.f32 %v2520_v38, %v2624_v30  ;;  %v915_v57 = vadd.f32 %v883_v45, %v785_v58 }
  0xe8   : > { %v1598_v16 = vadd.f32 %v1566_v4, %v1500_v3  ;;  %v503_v20 = vpop.f32.mrf.mxu0  ;;  %v1338_v59 = vld [vmem:[#allocation2 + $0x60] sm:$0xff]  ;;  %v1012_v51 = vadd.f32 %v980_v41, %v914_v43  ;;  %v981_v63 = vmul.f32 %v2491_v15, %v2640_v44  ;;  %v1305_v2 = vadd.f32 %v1273_v54, %v1207_v42 }
  0xe9   : > { %719 = vst [vmem:[#allocation2 + $0x69] sm:$0xff] %v2655_v14  ;;  %v587_v27 = vmul.f32 %v2404_v47, %v503_v20  ;;  %v1701_v31 = vmax.f32 %v1669_v28, 0.0  ;;  %v1371_v7 = vmul.f32 %v2532_v46, %v1338_v59  ;;  %v1078_v56 = vmul.f32 %v2508_v26, %v1338_v59 }
  0xea   : > { %v1634_v53 = vmul.f32 %v2579_v25, %v1598_v16  ;;  %v1470_v4 = vmul.f32 %v2551_v62, %v2655_v14  ;;  %v2692_v8 = vmin.f32 %v665_v55, 6.0  ;;  %v884_v10 = vmul.f32 %v2478_v9, %v2624_v30  ;;  %v536_v16 = vpop.f32.mrf.mxu2 }
  0xeb   : > { %v623_v17 = vadd.f32 %v2414_v49, %v587_v27  ;;  %v1733_v19 = vmin.f32 %v1701_v31, 6.0  ;;  %v1403_v52 = vadd.f32 %v1371_v7, %v1304_v13  ;;  %v1110_v20 = vadd.f32 %v1078_v56, %v1012_v51 }
  0xec   : > { %v1670_v40 = vadd.f32 %v2588_v33, %v1634_v53  ;;  %730 = vst [vmem:[#allocation2 + $0xf1] sm:$0xff] %v2692_v8  ;;  %v598_v21 = vmul.f32 %v2404_v47, %v536_v16  ;;  %v1013_v23 = vadd.f32 %v981_v63, %v915_v57  ;;  %v1177_v13 = vmul.f32 %v2520_v38, %v2655_v14 }
  0xed   : > { %v655_v50 = vmax.f32 %v623_v17, 0.0  ;;  %1801 = vmatmul.f32.gmra.mxu1 %v1733_v19  ;;  %v1501_v12 = vadd.f32 %v1469_v35, %v1403_v52  ;;  %v786_v29 = vmul.f32 %v2466_v5, %v1338_v59  ;;  %v885_v57 = vmul.f32 %v2478_v9, %v2655_v14 }
  0xee   : > { %v1702_v61 = vmax.f32 %v1670_v40, 0.0  ;;  %v634_v32 = vadd.f32 %v2414_v49, %v598_v21  ;;  %v1208_v40 = vadd.f32 %v1176_v34, %v1110_v20 }
  0xef   : > { %v2686_v60 = vmin.f32 %v655_v50, 6.0  ;;  %v916_v56 = vadd.f32 %v884_v10, %v786_v29 }
  0xf0   : > { %v506_v0 = vpop.f32.mrf.mxu0  ;;  %v1534_v1 = vld [vmem:[#allocation2 + $0x62] sm:$0xff]  ;;  %v1535_v18 = vld [vmem:[#allocation2 + $0x6a] sm:$0xff]  ;;  %v1734_v27 = vmin.f32 %v1702_v61, 6.0  ;;  %v666_v41 = vmax.f32 %v634_v32, 0.0 }
  0xf1   : > { %v1339_v3 = vld [vmem:[#allocation2 + $0x68] sm:$0xff]  ;;  %720 = vst [vmem:[#allocation2 + $0x79] sm:$0xff] %v2686_v60  ;;  %v588_v11 = vmul.f32 %v2404_v47, %v506_v0  ;;  %v1567_v28 = vmul.f32 %v2558_v6, %v1534_v1  ;;  %v1274_v7 = vmul.f32 %v2525_v39, %v1534_v1  ;;  %v1568_v19 = vmul.f32 %v2558_v6, %v1535_v18 }
  0xf2   : > { %v1372_v44 = vmul.f32 %v2532_v46, %v1339_v3  ;;  %v1079_v24 = vmul.f32 %v2508_v26, %v1339_v3  ;;  %v982_v48 = vmul.f32 %v2491_v15, %v1534_v1  ;;  %v787_v52 = vmul.f32 %v2466_v5, %v1339_v3  ;;  %v539_v0 = vpop.f32.mrf.mxu2 }
  0xf3   : > { %v624_v30 = vadd.f32 %v2414_v49, %v588_v11  ;;  %v1599_v31 = vadd.f32 %v1567_v28, %v1501_v12  ;;  %v1306_v59 = vadd.f32 %v1274_v7, %v1208_v40  ;;  %v2714_v55 = vmin.f32 %v666_v41, 6.0 }
  0xf4   : > { %v1404_v53 = vadd.f32 %v1372_v44, %v1305_v2  ;;  %v1111_v42 = vadd.f32 %v1079_v24, %v1013_v23  ;;  %v599_v2 = vmul.f32 %v2404_v47, %v539_v0  ;;  %v1014_v3 = vadd.f32 %v982_v48, %v916_v56 }
  0xf5   : > { %v656_v37 = vmax.f32 %v624_v30, 0.0  ;;  %1804 = vmatmul.f32.gmra.mxu1 %v1734_v27  ;;  %v1635_v58 = vmul.f32 %v2579_v25, %v1599_v31  ;;  %3525 = vst [vmem:[#allocation3_spill] sm:$0xff] %v2714_v55  ;;  %v917_v12 = vadd.f32 %v885_v57, %v787_v52  ;;  %v1471_v44 = vmul.f32 %v2551_v62, %v2686_v60 }
  0xf6   : > { %v1502_v17 = vadd.f32 %v1470_v4, %v1404_v53  ;;  %731 = vst [vmem:[#allocation2 + $0xf9] sm:$0xff] %v2714_v55  ;;  %v1209_v1 = vadd.f32 %v1177_v13, %v1111_v42  ;;  %v1275_v16 = vmul.f32 %v2525_v39, %v1535_v18  ;;  %v635_v20 = vadd.f32 %v2414_v49, %v599_v2 }
  0xf7   : > { %v688_v43 = vmin.f32 %v656_v37, 6.0  ;;  %v1671_v45 = vadd.f32 %v2588_v33, %v1635_v58  ;;  %v1178_v24 = vmul.f32 %v2520_v38, %v2686_v60  ;;  %v983_v30 = vmul.f32 %v2491_v15, %v1535_v18 }
  0xf8   : > { %v1600_v50 = vadd.f32 %v1568_v19, %v1502_v17  ;;  %v509_v35 = vpop.f32.mrf.mxu0  ;;  %v1340_v54 = vld [vmem:[#allocation2 + $0x78] sm:$0xff]  ;;  %v1307_v31 = vadd.f32 %v1275_v16, %v1209_v1  ;;  %v667_v53 = vmax.f32 %v635_v20, 0.0  ;;  %v886_v37 = vmul.f32 %v2478_v9, %v2686_v60 }
  0xf9   : > { %721 = vst [vmem:[#allocation2 + $0x81] sm:$0xff] %v688_v43  ;;  %v589_v34 = vmul.f32 %v2404_v47, %v509_v35  ;;  %v1703_v61 = vmax.f32 %v1671_v45, 0.0  ;;  %v1373_v63 = vmul.f32 %v2532_v46, %v1340_v54  ;;  %v1080_v4 = vmul.f32 %v2508_v26, %v1340_v54 }
  0xfa   : > { %v1636_v51 = vmul.f32 %v2579_v25, %v1600_v50  ;;  %v788_v7 = vmul.f32 %v2466_v5, %v1340_v54  ;;  %v1472_v13 = vmul.f32 %v2551_v62, %v688_v43  ;;  %v1015_v29 = vadd.f32 %v983_v30, %v917_v12  ;;  %v542_v35 = vpop.f32.mrf.mxu2 }
  0xfb   : > { %v625_v10 = vadd.f32 %v2414_v49, %v589_v34  ;;  %v1735_v14 = vmin.f32 %v1703_v61, 6.0  ;;  %v1405_v28 = vadd.f32 %v1373_v63, %v1306_v59  ;;  %v1112_v23 = vadd.f32 %v1080_v4, %v1014_v3 }
  0xfc   : > { %v1672_v11 = vadd.f32 %v2588_v33, %v1636_v51  ;;  %v2739_v41 = vmin.f32 %v667_v53, 6.0  ;;  %v1179_v18 = vmul.f32 %v2520_v38, %v688_v43  ;;  %v887_v42 = vmul.f32 %v2478_v9, %v688_v43 }
  0xfd   : > { %v657_v21 = vmax.f32 %v625_v10, 0.0  ;;  %1807 = vmatmul.f32.gmra.mxu1 %v1735_v14  ;;  %v1503_v17 = vadd.f32 %v1471_v44, %v1405_v28  ;;  %v1210_v60 = vadd.f32 %v1178_v24, %v1112_v23  ;;  %v600_v54 = vmul.f32 %v2404_v47, %v542_v35 }
  0xfe   : > { %v1704_v27 = vmax.f32 %v1672_v11, 0.0  ;;  %3526 = vst [vmem:[#allocation4_spill] sm:$0xff] %v2739_v41  ;;  %v918_v57 = vadd.f32 %v886_v37, %v788_v7 }
  0xff   : > { %v2734_v32 = vmin.f32 %v657_v21, 6.0  ;;  %732 = vst [vmem:[#allocation2 + $0x109] sm:$0xff] %v2739_v41  ;;  %v636_v0 = vadd.f32 %v2414_v49, %v600_v54 }
 0x100   : > { %v512_v58 = vpop.f32.mrf.mxu0  ;;  %v1536_v19 = vld [vmem:[#allocation2 + $0x7a] sm:$0xff]  ;;  %v1537_v52 = vld [vmem:[#allocation2 + $0x82] sm:$0xff]  ;;  %v1736_v59 = vmin.f32 %v1704_v27, 6.0 }
 0x101   : > { %v1341_v40 = vld [vmem:[#allocation2 + $0x80] sm:$0xff]  ;;  %722 = vst [vmem:[#allocation2 + $0x91] sm:$0xff] %v2734_v32  ;;  %v590_v48 = vmul.f32 %v2404_v47, %v512_v58  ;;  %v1569_v45 = vmul.f32 %v2558_v6, %v1536_v19  ;;  %v1276_v51 = vmul.f32 %v2525_v39, %v1536_v19  ;;  %v1570_v63 = vmul.f32 %v2558_v6, %v1537_v52 }
 0x102   : > { %v1374_v50 = vmul.f32 %v2532_v46, %v1341_v40  ;;  %v1081_v56 = vmul.f32 %v2508_v26, %v1341_v40  ;;  %v984_v2 = vmul.f32 %v2491_v15, %v1536_v19  ;;  %v1473_v14 = vmul.f32 %v2551_v62, %v2734_v32 }
 0x103   : > { %v626_v43 = vadd.f32 %v2414_v49, %v590_v48  ;;  %v1601_v34 = vadd.f32 %v1569_v45, %v1503_v17  ;;  %v668_v11 = vmax.f32 %v636_v0, 0.0  ;;  %v1277_v28 = vmul.f32 %v2525_v39, %v1537_v52  ;;  %v545_v17 = vpop.f32.mrf.mxu2 }
 0x104   : > { %v1406_v61 = vadd.f32 %v1374_v50, %v1307_v31  ;;  %v1113_v1 = vadd.f32 %v1081_v56, %v1015_v29  ;;  %v789_v44 = vmul.f32 %v2466_v5, %v1341_v40  ;;  %v1308_v23 = vadd.f32 %v1276_v51, %v1210_v60 }
 0x105   : > { %v658_v3 = vmax.f32 %v626_v43, 0.0  ;;  %1810 = vmatmul.f32.gmra.mxu1 %v1736_v59  ;;  %v1637_v4 = vmul.f32 %v2579_v25, %v1601_v34  ;;  %v2761_v27 = vmin.f32 %v668_v11, 6.0  ;;  %v1016_v31 = vadd.f32 %v984_v2, %v918_v57  ;;  %v2783_v2 = vld [vmem:[#allocation2 + $0xd8] sm:$0xff] }
 0x106   : > { %v1504_v10 = vadd.f32 %v1472_v13, %v1406_v61  ;;  %v1211_v12 = vadd.f32 %v1179_v18, %v1113_v1  ;;  %v1180_v53 = vmul.f32 %v2520_v38, %v2734_v32  ;;  %v919_v7 = vadd.f32 %v887_v42, %v789_v44  ;;  %v2779_v61 = vld [vmem:[#allocation2 + $0xda] sm:$0xff] }
 0x107   : > { %v690_v16 = vmin.f32 %v658_v3, 6.0  ;;  %v1673_v20 = vadd.f32 %v2588_v33, %v1637_v4  ;;  %3527 = vst [vmem:[#allocation5_spill] sm:$0xff] %v2761_v27  ;;  %v601_v40 = vmul.f32 %v2404_v47, %v545_v17  ;;  %v985_v48 = vmul.f32 %v2491_v15, %v1537_v52 }
 0x108   : > { %v1602_v21 = vadd.f32 %v1570_v63, %v1504_v10  ;;  %v515_v24 = vpop.f32.mrf.mxu0  ;;  %v1342_v30 = vld [vmem:[#allocation2 + $0x90] sm:$0xff]  ;;  %733 = vst [vmem:[#allocation2 + $0x111] sm:$0xff] %v2761_v27  ;;  %v1309_v19 = vadd.f32 %v1277_v28, %v1211_v12  ;;  %v888_v56 = vmul.f32 %v2478_v9, %v2734_v32  ;;  %v2789_v10 = vmul.f32 %v2508_v26, %v2783_v2 }
 0x109   : > { %723 = vst [vmem:[#allocation2 + $0x99] sm:$0xff] %v690_v16  ;;  %v591_v13 = vmul.f32 %v2404_v47, %v515_v24  ;;  %v1705_v29 = vmax.f32 %v1673_v20, 0.0  ;;  %v1375_v58 = vmul.f32 %v2532_v46, %v1342_v30  ;;  %v1082_v18 = vmul.f32 %v2508_v26, %v1342_v30 }
 0x10a   : > { %v1638_v37 = vmul.f32 %v2579_v25, %v1602_v21  ;;  %v637_v35 = vadd.f32 %v2414_v49, %v601_v40  ;;  %v790_v54 = vmul.f32 %v2466_v5, %v1342_v30  ;;  %v1474_v34 = vmul.f32 %v2551_v62, %v690_v16 }
 0x10b   : > { %v627_v42 = vadd.f32 %v2414_v49, %v591_v13  ;;  %v1737_v45 = vmin.f32 %v1705_v29, 6.0  ;;  %v1407_v60 = vadd.f32 %v1375_v58, %v1308_v23  ;;  %v1114_v59 = vadd.f32 %v1082_v18, %v1016_v31  ;;  %v548_v31 = vpop.f32.mrf.mxu2 }
 0x10c   : > { %v1674_v50 = vadd.f32 %v2588_v33, %v1638_v37  ;;  %v1017_v52 = vadd.f32 %v985_v48, %v919_v7  ;;  %v669_v63 = vmax.f32 %v637_v35, 0.0  ;;  %v1181_v0 = vmul.f32 %v2520_v38, %v690_v16 }
 0x10d   : > { %v659_v57 = vmax.f32 %v627_v42, 0.0  ;;  %1813 = vmatmul.f32.gmra.mxu1 %v1737_v45  ;;  %v1505_v51 = vadd.f32 %v1473_v14, %v1407_v60  ;;  %v889_v1 = vmul.f32 %v2478_v9, %v690_v16  ;;  %v1212_v4 = vadd.f32 %v1180_v53, %v1114_v59 }
 0x10e   : > { %v1706_v43 = vmax.f32 %v1674_v50, 0.0  ;;  %v920_v32 = vadd.f32 %v888_v56, %v790_v54  ;;  %v2791_v20 = vmin.f32 %v669_v63, 6.0  ;;  %v2795_v16 = vmul.f32 %v2520_v38, %v2630_v36 }
 0x10f   : > { %v2785_v3 = vmin.f32 %v659_v57, 6.0  ;;  %v2799_v21 = vmul.f32 %v2525_v39, %v2779_v61  ;;  %v2807_v53 = vmul.f32 %v2551_v62, %v2630_v36  ;;  %v602_v29 = vmul.f32 %v2404_v47, %v548_v31 }
 0x110   : > { %v518_v11 = vpop.f32.mrf.mxu0  ;;  %v1738_v12 = vmin.f32 %v1706_v43, 6.0  ;;  %v1538_v28 = vld [vmem:[#allocation2 + $0x92] sm:$0xff]  ;;  %v1539_v14 = vld [vmem:[#allocation2 + $0x9a] sm:$0xff]  ;;  %3528 = vst [vmem:[#allocation6_spill] sm:$0xff] %v2791_v20 }
 0x111   : > { %v1343_v44 = vld [vmem:[#allocation2 + $0x98] sm:$0xff]  ;;  %724 = vst [vmem:[#allocation2 + $0xa9] sm:$0xff] %v2785_v3  ;;  %v592_v23 = vmul.f32 %v2404_v47, %v518_v11  ;;  %v1571_v24 = vmul.f32 %v2558_v6, %v1538_v28  ;;  %v1572_v7 = vmul.f32 %v2558_v6, %v1539_v14  ;;  %v1278_v13 = vmul.f32 %v2525_v39, %v1538_v28 }
 0x112   : > { %v1376_v30 = vmul.f32 %v2532_v46, %v1343_v44  ;;  %734 = vst [vmem:[#allocation2 + $0x121] sm:$0xff] %v2791_v20  ;;  %v1083_v37 = vmul.f32 %v2508_v26, %v1343_v44  ;;  %v1475_v18 = vmul.f32 %v2551_v62, %v2785_v3  ;;  %v638_v36 = vadd.f32 %v2414_v49, %v602_v29 }
 0x113   : > { %v628_v58 = vadd.f32 %v2414_v49, %v592_v23  ;;  %v1603_v17 = vadd.f32 %v1571_v24, %v1505_v51  ;;  %v1279_v42 = vmul.f32 %v2525_v39, %v1539_v14  ;;  %v986_v45 = vmul.f32 %v2491_v15, %v1538_v28  ;;  %v551_v31 = vpop.f32.mrf.mxu2 }
 0x114   : > { %v1408_v40 = vadd.f32 %v1376_v30, %v1309_v19  ;;  %v1115_v48 = vadd.f32 %v1083_v37, %v1017_v52  ;;  %v1310_v59 = vadd.f32 %v1278_v13, %v1212_v4  ;;  %v670_v54 = vmax.f32 %v638_v36, 0.0 }
 0x115   : > { %v660_v50 = vmax.f32 %v628_v58, 0.0  ;;  %1816 = vmatmul.f32.gmra.mxu1 %v1738_v12  ;;  %v1639_v60 = vmul.f32 %v2579_v25, %v1603_v17  ;;  %v1182_v19 = vmul.f32 %v2520_v38, %v2785_v3  ;;  %v791_v57 = vmul.f32 %v2466_v5, %v1343_v44 }
 0x116   : > { %v1506_v35 = vadd.f32 %v1474_v34, %v1408_v40  ;;  %v1213_v56 = vadd.f32 %v1181_v0, %v1115_v48  ;;  %v1018_v63 = vadd.f32 %v986_v45, %v920_v32  ;;  %v2827_v12 = vmin.f32 %v670_v54, 6.0 }
 0x117   : > { %v2824_v43 = vmin.f32 %v660_v50, 6.0  ;;  %v1675_v52 = vadd.f32 %v2588_v33, %v1639_v60  ;;  %v921_v34 = vadd.f32 %v889_v1, %v791_v57  ;;  %v987_v4 = vmul.f32 %v2491_v15, %v1539_v14 }
 0x118   : > { %v1604_v51 = vadd.f32 %v1572_v7, %v1506_v35  ;;  %v521_v11 = vpop.f32.mrf.mxu0  ;;  %v1344_v28 = vld [vmem:[#allocation2 + $0xa8] sm:$0xff]  ;;  %3529 = vst [vmem:[#allocation7_spill] sm:$0xff] %v2827_v12  ;;  %v1311_v23 = vadd.f32 %v1279_v42, %v1213_v56  ;;  %v603_v7 = vmul.f32 %v2404_v47, %v551_v31  ;;  %v2841_v14 = vmul.f32 %v2551_v62, %v2692_v8  ;;  %v2854_v35 = vld [vmem:[#allocation2 + $0xf2] sm:$0xff] }
 0x119   : > { %725 = vst [vmem:[#allocation2 + $0xb1] sm:$0xff] %v2824_v43  ;;  %v593_v0 = vmul.f32 %v2404_v47, %v521_v11  ;;  %v1707_v24 = vmax.f32 %v1675_v52, 0.0  ;;  %v1377_v30 = vmul.f32 %v2532_v46, %v1344_v28  ;;  %v1476_v32 = vmul.f32 %v2551_v62, %v2824_v43  ;;  %v2848_v47 = vld [vmem:[#allocation2 + $0xf0] sm:$0xff] }
 0x11a   : > { %v1640_v44 = vmul.f32 %v2579_v25, %v1604_v51  ;;  %735 = vst [vmem:[#allocation2 + $0x129] sm:$0xff] %v2827_v12  ;;  %v1084_v1 = vmul.f32 %v2508_v26, %v1344_v28  ;;  %v639_v17 = vadd.f32 %v2414_v49, %v603_v7  ;;  %v1019_v36 = vadd.f32 %v987_v4, %v921_v34 }
 0x11b   : > { %v629_v13 = vadd.f32 %v2414_v49, %v593_v0  ;;  %v1739_v29 = vmin.f32 %v1707_v24, 6.0  ;;  %v1409_v58 = vadd.f32 %v1377_v30, %v1310_v59  ;;  %v1183_v48 = vmul.f32 %v2520_v38, %v2824_v43  ;;  %v2856_v59 = vld [vmem:[#allocation2 + $0xe0] sm:$0xff]  ;;  %v554_v7 = vpop.f32.mrf.mxu2 }
 0x11c   : > { %v1676_v37 = vadd.f32 %v2588_v33, %v1640_v44  ;;  %v1116_v40 = vadd.f32 %v1084_v1, %v1018_v63  ;;  %v2852_v60 = vmul.f32 %v2532_v46, %v2848_v47  ;;  %v671_v49 = vmax.f32 %v639_v17, 0.0  ;;  %v2906_v17 = vld [vmem:[%s3500_s3] ss:$0 sm:$0xff] }
 0x11d   : > { %v661_v42 = vmax.f32 %v629_v13, 0.0  ;;  %1819 = vmatmul.f32.gmra.mxu1 %v1739_v29  ;;  %v1507_v50 = vadd.f32 %v1475_v18, %v1409_v58  ;;  %v2860_v54 = vmul.f32 %v2558_v6, %v2854_v35  ;;  %v792_v56 = vmul.f32 %v2466_v5, %v1344_v28 }
 0x11e   : > { %v1708_v45 = vmax.f32 %v1676_v37, 0.0  ;;  %v890_v57 = vmul.f32 %v2478_v9, %v2785_v3  ;;  %v1214_v51 = vadd.f32 %v1182_v19, %v1116_v40  ;;  %v2867_v63 = vmul.f32 %v2532_v46, %v2783_v2  ;;  %v2886_v19 = vld [vmem:[%s3499_s2] ss:$0 sm:$0xff] }
 0x11f   : > { %v693_v52 = vmin.f32 %v661_v42, 6.0  ;;  %v2873_v24 = vmin.f32 %v671_v49, 6.0  ;;  %v2877_v5 = vmul.f32 %v2558_v6, %v2779_v61  ;;  %v2881_v3 = vmul.f32 %v2508_v26, %v2856_v59 }
 0x120   : > { %v1740_v18 = vmin.f32 %v1708_v45, 6.0  ;;  %v524_v11 = vpop.f32.mrf.mxu0  ;;  %v1540_v34 = vld [vmem:[#allocation2 + $0xaa] sm:$0xff]  ;;  %v2871_v0 = vld [vmem:[#allocation2 + $0xb2] sm:$0xff]  ;;  %v922_v44 = vadd.f32 %v890_v57, %v792_v56  ;;  %v2894_v1 = vmul.f32 %v2520_v38, %v2660_v22  ;;  %v604_v37 = vmul.f32 %v2886_v19, %v554_v7 }
 0x121   : > { %v2869_v4 = vld [vmem:[#allocation2 + $0xb0] sm:$0xff]  ;;  %3530 = vst [vmem:[#allocation8_spill] sm:$0xff] %v2873_v24  ;;  %v594_v28 = vmul.f32 %v2886_v19, %v524_v11  ;;  %v1573_v30 = vmul.f32 %v2558_v6, %v1540_v34  ;;  %v1574_v13 = vmul.f32 %v2558_v6, %v2871_v0  ;;  %v1280_v29 = vmul.f32 %v2525_v39, %v1540_v34 }
 0x122   : > { %726 = vst [vmem:[#allocation2 + $0xc1] sm:$0xff] %v693_v52  ;;  %v1378_v31 = vmul.f32 %v2532_v46, %v2869_v4  ;;  %v1085_v58 = vmul.f32 %v2508_v26, %v2869_v4  ;;  %v1477_v49 = vmul.f32 %v2551_v62, %v693_v52  ;;  %v640_v57 = vadd.f32 %v2906_v17, %v604_v37 }
 0x123   : > { %736 = vst [vmem:[#allocation2 + $0x139] sm:$0xff] %v2873_v24  ;;  %v630_v40 = vadd.f32 %v2906_v17, %v594_v28  ;;  %v1605_v42 = vadd.f32 %v1573_v30, %v1507_v50  ;;  %v1312_v56 = vadd.f32 %v1280_v29, %v1214_v51  ;;  %v1281_v7 = vmul.f32 %v2525_v39, %v2871_v0  ;;  %v2917_v51 = vld [vmem:[#allocation2 + $0xe2] sm:$0xff]  ;;  %v2924_v29 = vld [vmem:[#allocation2 + $0xf8] sm:$0xff] }
 0x124   : > { %v1410_v45 = vadd.f32 %v1378_v31, %v1311_v23  ;;  %v1117_v11 = vadd.f32 %v1085_v58, %v1019_v36  ;;  %v988_v27 = vmul.f32 %v2491_v15, %v1540_v34  ;;  %v672_v41 = vmax.f32 %v640_v57, 0.0  ;;  %3531 = vst [vmem:[#allocation9_spill] sm:$0xff] %v2924_v29 }
 0x125   : > { %v662_v24 = vmax.f32 %v630_v40, 0.0  ;;  %1822 = vmatmul.f32.gmra.mxu1 %v1740_v18  ;;  %v1641_v12 = vmul.f32 %v2579_v25, %v1605_v42  ;;  %v892_v23 = vmul.f32 %v2478_v9, %v693_v52  ;;  %v1184_v50 = vmul.f32 %v2520_v38, %v693_v52 }
 0x126   : > { %v1508_v20 = vadd.f32 %v1476_v32, %v1410_v45  ;;  %v1215_v28 = vadd.f32 %v1183_v48, %v1117_v11  ;;  %v2922_v18 = vmul.f32 %v2525_v39, %v2917_v51  ;;  %v2926_v15 = vmin.f32 %v672_v41, 6.0  ;;  %v2952_v45 = vld [vmem:[%s3501_s4 + $0x1] ss:$0 sm:$0xff] }
 0x127   : > { %v694_v30 = vmin.f32 %v662_v24, 6.0  ;;  %v1677_v36 = vadd.f32 %v2588_v33, %v1641_v12  ;;  %v1020_v34 = vadd.f32 %v988_v27, %v922_v44  ;;  %v2930_v9 = vmul.f32 %v2532_v46, %v2924_v29  ;;  %v557_v24 = vpop.f32.mrf.mxu2  ;;  %v2944_v44 = vld [vmem:[%s3501_s4] ss:$0 sm:$0xff] }
 0x128   : > { %v1606_v31 = vadd.f32 %v1574_v13, %v1508_v20  ;;  %3532 = vst [vmem:[#allocation10_spill] sm:$0xff] %v2926_v15  ;;  %v1313_v48 = vadd.f32 %v1281_v7, %v1215_v28  ;;  %v2936_v39 = vmul.f32 %v2551_v62, %v2714_v55  ;;  %v605_v27 = vmul.f32 %v2886_v19, %v557_v24  ;;  %v3005_v55 = vld [vmem:[%s3501_s4 + $0x3] ss:$0 sm:$0xff] }
 0x129   : > { %v1346_v32 = vld [vmem:[#allocation2 + $0xc0] sm:$0xff]  ;;  %727 = vst [vmem:[#allocation2 + $0xc9] sm:$0xff] %v694_v30  ;;  %v1709_v52 = vmax.f32 %v1677_v36, 0.0  ;;  %v1478_v41 = vmul.f32 %v2551_v62, %v694_v30  ;;  %v893_v57 = vmul.f32 %v2952_v45, %v694_v30  ;;  %v793_v36 = vmul.f32 %v2944_v44, %v2869_v4 }
 0x12a   : > { %v1642_v12 = vmul.f32 %v2579_v25, %v1606_v31  ;;  %v1379_v20 = vmul.f32 %v2532_v46, %v1346_v32  ;;  %737 = vst [vmem:[#allocation2 + $0x141] sm:$0xff] %v2926_v15  ;;  %v794_v13 = vmul.f32 %v2944_v44, %v1346_v32  ;;  %v1086_v37 = vmul.f32 %v2508_v26, %v1346_v32  ;;  %v2963_v32 = vld [vmem:[%s3501_s4 + $0x2] ss:$0 sm:$0xff] }
 0x12b   : > { %v1741_v58 = vmin.f32 %v1709_v52, 6.0  ;;  %v641_v11 = vadd.f32 %v2906_v17, %v605_v27  ;;  %v989_v52 = vmul.f32 %v2963_v32, %v2871_v0  ;;  %v2970_v4 = vmul.f32 %v2532_v46, %v2856_v59 }
 0x12c   : > { %v1678_v40 = vadd.f32 %v2588_v33, %v1642_v12  ;;  %v1411_v42 = vadd.f32 %v1379_v20, %v1312_v56  ;;  %v924_v7 = vadd.f32 %v892_v23, %v794_v13  ;;  %v1118_v28 = vadd.f32 %v1086_v37, %v1020_v34  ;;  %v861_v12 = vld [vmem:[#allocation2 + $0xd9] sm:$0xff] }
 0x12d   : > { %1825 = vmatmul.f32.gmra.mxu1 %v1741_v58  ;;  %v891_v56 = vmul.f32 %v2952_v45, %v2824_v43  ;;  %v673_v23 = vmax.f32 %v641_v11, 0.0  ;;  %v1185_v20 = vmul.f32 %v2520_v38, %v694_v30  ;;  %v2974_v43 = vmul.f32 %v2551_v62, %v2660_v22 }
 0x12e   : > { %v1710_v26 = vmax.f32 %v1678_v40, 0.0  ;;  %v1509_v31 = vadd.f32 %v1477_v49, %v1411_v42  ;;  %v1216_v34 = vadd.f32 %v1184_v50, %v1118_v28  ;;  %v2978_v27 = vmul.f32 %v2558_v6, %v2917_v51 }
 0x12f   : > { %v923_v24 = vadd.f32 %v891_v56, %v793_v36  ;;  %v2980_v50 = vmin.f32 %v673_v23, 6.0  ;;  %v796_v38 = vmul.f32 %v2944_v44, %v2783_v2  ;;  %v894_v30 = vmul.f32 %v2952_v45, %v861_v12  ;;  %v560_v11 = vpop.f32.mrf.mxu2  ;;  %v2995_v2 = vld [vmem:[%s3501_s4 + $0x5] ss:$0 sm:$0xff] }
 0x130   : > { %v1742_v49 = vmin.f32 %v1710_v26, 6.0  ;;  %v1542_v0 = vld [vmem:[#allocation2 + $0xc2] sm:$0xff]  ;;  %v1543_v37 = vld [vmem:[#allocation2 + $0xca] sm:$0xff]  ;;  %v992_v58 = vmul.f32 %v2963_v32, %v2779_v61  ;;  %v606_v61 = vmul.f32 %v2886_v19, %v560_v11 }
 0x131   : > { %v1347_v13 = vld [vmem:[#allocation2 + $0xc8] sm:$0xff]  ;;  %3533 = vst [vmem:[#allocation11_spill] sm:$0xff] %v2980_v50  ;;  %v1575_v62 = vmul.f32 %v2558_v6, %v1542_v0  ;;  %v1576_v40 = vmul.f32 %v2558_v6, %v1543_v37  ;;  %v990_v42 = vmul.f32 %v2963_v32, %v1542_v0  ;;  %v1282_v28 = vmul.f32 %v2995_v2, %v1542_v0 }
 0x132   : > { %v1380_v22 = vmul.f32 %v2532_v46, %v1347_v13  ;;  %738 = vst [vmem:[#allocation2 + $0x151] sm:$0xff] %v2980_v50  ;;  %v795_v36 = vmul.f32 %v2944_v44, %v1347_v13  ;;  %v991_v46 = vmul.f32 %v2963_v32, %v1543_v37  ;;  %v1021_v12 = vadd.f32 %v989_v52, %v923_v24 }
 0x133   : > { %v1607_v26 = vadd.f32 %v1575_v62, %v1509_v31  ;;  %v1022_v56 = vadd.f32 %v990_v42, %v924_v7  ;;  %v1314_v23 = vadd.f32 %v1282_v28, %v1216_v34  ;;  %v642_v50 = vadd.f32 %v2906_v17, %v606_v61 }
 0x134   : > { %v1412_v6 = vadd.f32 %v1380_v22, %v1313_v48  ;;  %v925_v15 = vadd.f32 %v893_v57, %v795_v36  ;;  %v1087_v0 = vmul.f32 %v3005_v55, %v1347_v13  ;;  %v1283_v48 = vmul.f32 %v2995_v2, %v1543_v37 }
 0x135   : > { %1828 = vmatmul.f32.gmra.mxu1 %v1742_v49  ;;  %v1643_v11 = vmul.f32 %v2579_v25, %v1607_v26  ;;  %v1120_v31 = vadd.f32 %v2789_v10, %v1022_v56  ;;  %v1413_v7 = vadd.f32 %v2867_v63, %v1314_v23  ;;  %v674_v52 = vmax.f32 %v642_v50, 0.0  ;;  %v3051_v23 = vld [vmem:[%s3501_s4 + $0x8] ss:$0 sm:$0xff] }
 0x136   : > { %v1510_v29 = vadd.f32 %v1478_v41, %v1412_v6  ;;  %v1023_v34 = vadd.f32 %v991_v46, %v925_v15  ;;  %v1119_v57 = vadd.f32 %v1087_v0, %v1021_v12  ;;  %v926_v42 = vadd.f32 %v894_v30, %v796_v38  ;;  %v3045_v12 = vld [vmem:[#allocation2 + $0x108] sm:$0xff] }
 0x137   : > { %v1679_v24 = vadd.f32 %v2588_v33, %v1643_v11  ;;  %v1218_v22 = vadd.f32 %v2795_v16, %v1120_v31  ;;  %v1511_v49 = vadd.f32 %v2807_v53, %v1413_v7  ;;  %v3015_v13 = vmin.f32 %v674_v52, 6.0  ;;  %v563_v15 = vpop.f32.mrf.mxu2  ;;  %v3057_v0 = vld [vmem:[#allocation2 + $0x10a] sm:$0xff] }
 0x138   : > { %v1608_v62 = vadd.f32 %v1576_v40, %v1510_v29  ;;  %v1121_v41 = vadd.f32 %v2881_v3, %v1023_v34  ;;  %v1217_v10 = vadd.f32 %v1185_v20, %v1119_v57  ;;  %v1024_v50 = vadd.f32 %v992_v58, %v926_v42  ;;  %v3072_v34 = vld [vmem:[%s3501_s4 + $0x6] ss:$0 sm:$0xff]  ;;  %v3534_v57 = vld [vmem:[#allocation4_spill] sm:$0xff] }
 0x139   : > { %v1711_v28 = vmax.f32 %v1679_v24, 0.0  ;;  %v1316_v63 = vadd.f32 %v2799_v21, %v1218_v22  ;;  %v1609_v61 = vadd.f32 %v2877_v5, %v1511_v49  ;;  %739 = vst [vmem:[#allocation2 + $0x159] sm:$0xff] %v3015_v13  ;;  %v607_v53 = vmul.f32 %v2886_v19, %v563_v15  ;;  %v862_v22 = vld [vmem:[#allocation2 + $0xe1] sm:$0xff] }
 0x13a   : > { %v1644_v37 = vmul.f32 %v2579_v25, %v1608_v62  ;;  %v1219_v16 = vadd.f32 %v2894_v1, %v1121_v41  ;;  %v1315_v29 = vadd.f32 %v1283_v48, %v1217_v10  ;;  %v1090_v30 = vmul.f32 %v3005_v55, %v2848_v47  ;;  %v3066_v48 = vld [vmem:[%s3502_s5] ss:$0 sm:$0xff] }
 0x13b   : > { %v1743_v38 = vmin.f32 %v1711_v28, 6.0  ;;  %v1415_v20 = vadd.f32 %v2852_v60, %v1316_v63  ;;  %v1645_v21 = vmul.f32 %v2579_v25, %v1609_v61  ;;  %v643_v40 = vadd.f32 %v2906_v17, %v607_v53  ;;  %v3036_v60 = vld [vmem:[%s3501_s4 + $0x4] ss:$0 sm:$0xff]  ;;  %v3090_v28 = vld [vmem:[%s3503_s6] ss:$0 sm:$0xff] }
 0x13c   : > { %v1680_v3 = vadd.f32 %v2588_v33, %v1644_v37  ;;  %v1317_v58 = vadd.f32 %v2922_v18, %v1219_v16  ;;  %v1414_v5 = vadd.f32 %v2970_v4, %v1315_v29  ;;  %v1122_v46 = vadd.f32 %v1090_v30, %v1024_v50  ;;  %v3042_v4 = vld [vmem:[#allocation2 + $0xfa] sm:$0xff] }
 0x13d   : > { %1831 = vmatmul.f32.gmra.mxu1 %v1743_v38  ;;  %v1513_v36 = vadd.f32 %v2841_v14, %v1415_v20  ;;  %v1188_v26 = vmul.f32 %v3036_v60, %v2692_v8  ;;  %v1681_v25 = vadd.f32 %v2588_v33, %v1645_v21  ;;  %v675_v56 = vmax.f32 %v643_v40, 0.0 }
 0x13e   : > { %v1712_v1 = vmax.f32 %v1680_v3, 0.0  ;;  %v1416_v18 = vadd.f32 %v2930_v9, %v1317_v58  ;;  %v1512_v6 = vadd.f32 %v2974_v43, %v1414_v5  ;;  %v1580_v8 = vmul.f32 %v3051_v23, %v3042_v4  ;;  %v3535_v5 = vld [vmem:[#allocation9_spill] sm:$0xff] }
 0x13f   : > { %v1611_v14 = vadd.f32 %v2860_v54, %v1513_v36  ;;  %v1220_v33 = vadd.f32 %v1188_v26, %v1122_v46  ;;  %v1286_v9 = vmul.f32 %v2995_v2, %v2854_v35  ;;  %v3061_v54 = vmin.f32 %v675_v56, 6.0  ;;  %v566_v62 = vpop.f32.mrf.mxu2 }
 0x140   : > { %v1744_v43 = vmin.f32 %v1712_v1, 6.0  ;;  %v1514_v11 = vadd.f32 %v2936_v39, %v1416_v18  ;;  %v1610_v31 = vadd.f32 %v2978_v27, %v1512_v6  ;;  %v1385_v39 = vmul.f32 %v3072_v34, %v3045_v12  ;;  %v3079_v27 = vld [vmem:[%s3501_s4 + $0x7] ss:$0 sm:$0xff]  ;;  %v3107_v18 = vld [vmem:[#allocation2 + $0x110] sm:$0xff] }
 0x141   : > { %v1647_v7 = vmul.f32 %v3066_v48, %v1611_v14  ;;  %v1318_v52 = vadd.f32 %v1286_v9, %v1220_v33  ;;  %v1483_v24 = vmul.f32 %v3079_v27, %v3534_v57  ;;  %v1713_v42 = vmax.f32 %v1681_v25, 0.0  ;;  %740 = vst [vmem:[#allocation2 + $0x169] sm:$0xff] %v3061_v54  ;;  %v3536_v25 = vld [vmem:[#allocation3_spill] sm:$0xff] }
 0x142   : > { %v1612_v49 = vadd.f32 %v1580_v8, %v1514_v11  ;;  %v1646_v41 = vmul.f32 %v3066_v48, %v1610_v31  ;;  %v1581_v10 = vmul.f32 %v3051_v23, %v3057_v0  ;;  %v608_v15 = vmul.f32 %v2886_v19, %v566_v62  ;;  %v863_v6 = vld [vmem:[#allocation2 + $0xf1] sm:$0xff] }
 0x143   : > { %v1683_v37 = vadd.f32 %v3090_v28, %v1647_v7  ;;  %v1417_v63 = vadd.f32 %v1385_v39, %v1318_v52  ;;  %v797_v50 = vmul.f32 %v2944_v44, %v2856_v59  ;;  %v895_v29 = vmul.f32 %v2952_v45, %v862_v22  ;;  %v3114_v9 = vld [vmem:[#allocation2 + $0x112] sm:$0xff] }
 0x144   : > { %v1648_v61 = vmul.f32 %v3066_v48, %v1612_v49  ;;  %v1682_v16 = vadd.f32 %v3090_v28, %v1646_v41  ;;  %v993_v53 = vmul.f32 %v2963_v32, %v2917_v51  ;;  %v644_v20 = vadd.f32 %v2906_v17, %v608_v15  ;;  %v3537_v49 = vld [vmem:[#allocation5_spill] sm:$0xff] }
 0x145   : > { %1834 = vmatmul.f32.gmra.mxu1 %v1744_v43  ;;  %v1715_v38 = vmax.f32 %v1683_v37, 0.0  ;;  %v1515_v3 = vadd.f32 %v1483_v24, %v1417_v63  ;;  %v927_v58 = vadd.f32 %v895_v29, %v797_v50  ;;  %v1091_v59 = vmul.f32 %v3005_v55, %v3535_v5  ;;  %v864_v37 = vld [vmem:[#allocation2 + $0xf9] sm:$0xff] }
 0x146   : > { %v1684_v30 = vadd.f32 %v3090_v28, %v1648_v61  ;;  %v1714_v21 = vmax.f32 %v1682_v16, 0.0  ;;  %v676_v36 = vmax.f32 %v644_v20, 0.0  ;;  %v1745_v46 = vmin.f32 %v1713_v42, 6.0 }
 0x147   : > { %v1747_v40 = vmin.f32 %v1715_v38, 6.0  ;;  %v1613_v1 = vadd.f32 %v1581_v10, %v1515_v3  ;;  %v1025_v26 = vadd.f32 %v993_v53, %v927_v58  ;;  %v1189_v51 = vmul.f32 %v3036_v60, %v3536_v25  ;;  %v569_v43 = vpop.f32.mrf.mxu2  ;;  %v3137_v38 = vld [vmem:[#allocation2 + $0x122] sm:$0xff] }
 0x148   : > { %v1716_v56 = vmax.f32 %v1684_v30, 0.0  ;;  %v3110_v8 = vmin.f32 %v676_v36, 6.0  ;;  %v1287_v33 = vmul.f32 %v2995_v2, %v3042_v4  ;;  %v1746_v11 = vmin.f32 %v1714_v21, 6.0 }
 0x149   : > { %1843 = vmatmul.f32.vlgmr.msra.gmra.mxu3 %v1747_v40  ;;  %v1649_v14 = vmul.f32 %v3066_v48, %v1613_v1  ;;  %v1123_v31 = vadd.f32 %v1091_v59, %v1025_v26  ;;  %v609_v7 = vmul.f32 %v2886_v19, %v569_v43  ;;  %v798_v52 = vmul.f32 %v2944_v44, %v2848_v47  ;;  %v3538_v1 = vld [vmem:[#allocation6_spill] sm:$0xff] }
 0x14a   : > { %741 = vst [vmem:[#allocation2 + $0x171] sm:$0xff] %v3110_v8  ;;  %v1386_v24 = vmul.f32 %v3072_v34, %v3107_v18  ;;  %v896_v62 = vmul.f32 %v2952_v45, %v863_v6  ;;  %v994_v22 = vmul.f32 %v2963_v32, %v2854_v35  ;;  %v1484_v41 = vmul.f32 %v3079_v27, %v3537_v49  ;;  %v3135_v35 = vld [vmem:[#allocation2 + $0x120] sm:$0xff] }
 0x14b   : > { %v1685_v39 = vadd.f32 %v3090_v28, %v1649_v14  ;;  %v1221_v42 = vadd.f32 %v1189_v51, %v1123_v31  ;;  %v1582_v10 = vmul.f32 %v3051_v23, %v3114_v9  ;;  %v645_v47 = vadd.f32 %v2906_v17, %v609_v7  ;;  %v3160_v7 = vld [vmem:[#allocation2 + $0x128] sm:$0xff] }
 0x14c   : > { %v1748_v63 = vmin.f32 %v1716_v56, 6.0  ;;  %v928_v15 = vadd.f32 %v896_v62, %v798_v52  ;;  %v1092_v50 = vmul.f32 %v3005_v55, %v3045_v12  ;;  %v1190_v61 = vmul.f32 %v3036_v60, %v3534_v57 }
 0x14d   : > { %1837 = vmatmul.f32.gmra.mxu1 %v1745_v46  ;;  %v1717_v16 = vmax.f32 %v1685_v39, 0.0  ;;  %v1319_v29 = vadd.f32 %v1287_v33, %v1221_v42  ;;  %v677_v53 = vmax.f32 %v645_v47, 0.0  ;;  %v799_v3 = vmul.f32 %v2944_v44, %v3535_v5  ;;  %v865_v46 = vld [vmem:[#allocation2 + $0x109] sm:$0xff] }
 0x14e   : > { %v1026_v20 = vadd.f32 %v994_v22, %v928_v15  ;;  %v1288_v30 = vmul.f32 %v2995_v2, %v3057_v0  ;;  %v897_v21 = vmul.f32 %v2952_v45, %v864_v37  ;;  %v995_v58 = vmul.f32 %v2963_v32, %v3042_v4  ;;  %v866_v15 = vld [vmem:[#allocation2 + $0x111] sm:$0xff] }
 0x14f   : > { %v1418_v57 = vadd.f32 %v1386_v24, %v1319_v29  ;;  %v3146_v59 = vmin.f32 %v677_v53, 6.0  ;;  %v1387_v40 = vmul.f32 %v3072_v34, %v3135_v35  ;;  %v1485_v36 = vmul.f32 %v3079_v27, %v3538_v1  ;;  %v572_v25 = vpop.f32.mrf.mxu2  ;;  %v3186_v53 = vld [vmem:[#allocation2 + $0x138] sm:$0xff] }
 0x150   : > { %v1124_v5 = vadd.f32 %v1092_v50, %v1026_v20  ;;  %v1583_v26 = vmul.f32 %v3051_v23, %v3137_v38  ;;  %v929_v51 = vadd.f32 %v897_v21, %v799_v3  ;;  %v1093_v4 = vmul.f32 %v3005_v55, %v3107_v18 }
 0x151   : > { %1846 = vmatmul.f32.gmra.mxu3 %v1748_v63  ;;  %v1749_v6 = vmin.f32 %v1717_v16, 6.0  ;;  %v1516_v56 = vadd.f32 %v1484_v41, %v1418_v57  ;;  %742 = vst [vmem:[#allocation2 + $0x181] sm:$0xff] %v3146_v59  ;;  %v610_v14 = vmul.f32 %v2886_v19, %v572_v25  ;;  %v1191_v33 = vmul.f32 %v3036_v60, %v3537_v49 }
 0x152   : > { %v1222_v43 = vadd.f32 %v1190_v61, %v1124_v5  ;;  %v1027_v31 = vadd.f32 %v995_v58, %v929_v51  ;;  %v800_v52 = vmul.f32 %v2944_v44, %v3045_v12  ;;  %v898_v39 = vmul.f32 %v2952_v45, %v865_v46  ;;  %v3182_v61 = vld [vmem:[#allocation2 + $0x12a] sm:$0xff]  ;;  %v3198_v58 = vld [vmem:[%s3506_s9] ss:$0 sm:$0xff] }
 0x153   : > { %v1614_v24 = vadd.f32 %v1582_v10, %v1516_v56  ;;  %v646_v62 = vadd.f32 %v2906_v17, %v610_v14  ;;  %v1289_v22 = vmul.f32 %v2995_v2, %v3114_v9  ;;  %v996_v19 = vmul.f32 %v2963_v32, %v3057_v0  ;;  %v3539_v17 = vld [vmem:[#allocation7_spill] sm:$0xff]  ;;  %v3180_v0 = vld [vmem:[%s3505_s8] ss:$0 sm:$0xff] }
 0x154   : > { %v1320_v42 = vadd.f32 %v1288_v30, %v1222_v43  ;;  %v1125_v49 = vadd.f32 %v1093_v4, %v1027_v31  ;;  %v930_v41 = vadd.f32 %v898_v39, %v800_v52  ;;  %v1094_v47 = vmul.f32 %v3005_v55, %v3135_v35 }
 0x155   : > { %1840 = vmatmul.f32.gmra.mxu1 %v1746_v11  ;;  %v1650_v12 = vmul.f32 %v3066_v48, %v1614_v24  ;;  %v678_v37 = vmax.f32 %v646_v62, 0.0  ;;  %v1388_v10 = vmul.f32 %v3072_v34, %v3160_v7  ;;  %v1486_v63 = vmul.f32 %v3079_v27, %v3539_v17 }
 0x156   : > { %v1419_v11 = vadd.f32 %v1387_v40, %v1320_v42  ;;  %v1223_v50 = vadd.f32 %v1191_v33, %v1125_v49  ;;  %v1028_v16 = vadd.f32 %v996_v19, %v930_v41  ;;  %v1192_v29 = vmul.f32 %v3036_v60, %v3538_v1  ;;  %v3540_v33 = vld [vmem:[#allocation8_spill] sm:$0xff]  ;;  %v2165_v41 = vld [vmem:[%s2327_s30] sm:$0xff] }
 0x157   : > { %v1686_v3 = vadd.f32 %v3090_v28, %v1650_v12  ;;  %v3189_v20 = vmin.f32 %v678_v37, 6.0  ;;  %v1290_v30 = vmul.f32 %v2995_v2, %v3137_v38  ;;  %v801_v21 = vmul.f32 %v2944_v44, %v3107_v18 }
 0x158   : > { %v1517_v57 = vadd.f32 %v1485_v36, %v1419_v11  ;;  %v1321_v40 = vadd.f32 %v1289_v22, %v1223_v50  ;;  %v1126_v1 = vadd.f32 %v1094_v47, %v1028_v16  ;;  %v899_v46 = vmul.f32 %v2952_v45, %v866_v15  ;;  %v1552_v15 = vld [vmem:[#allocation2 + $0x13a] sm:$0xff] }
 0x159   : > { %1849 = vmatmul.f32.gmra.mxu3 %v1749_v6  ;;  %v1718_v25 = vmax.f32 %v1686_v3, 0.0  ;;  %743 = vst [vmem:[#allocation2 + $0x189] sm:$0xff] %v3189_v20  ;;  %v1584_v51 = vmul.f32 %v3051_v23, %v3182_v61  ;;  %v1389_v18 = vmul.f32 %v3072_v34, %v3186_v53  ;;  %v997_v4 = vmul.f32 %v2963_v32, %v3114_v9  ;;  %v867_v9 = vld [vmem:[#allocation2 + $0x121] sm:$0xff] }
 0x15a   : > { %v1796_v5 = vpop.f32.mrf.mxu1  ;;  %v1615_v6 = vadd.f32 %v1583_v26, %v1517_v57  ;;  %v1420_v56 = vadd.f32 %v1388_v10, %v1321_v40  ;;  %v1224_v14 = vadd.f32 %v1192_v29, %v1126_v1  ;;  %v1487_v43 = vmul.f32 %v3079_v27, %v3540_v33 }
 0x15b   : > { %v1896_v36 = vmul.f32 %v3180_v0, %v1796_v5  ;;  %v931_v31 = vadd.f32 %v899_v46, %v801_v21  ;;  %v1095_v52 = vmul.f32 %v3005_v55, %v3160_v7  ;;  %v1750_v26 = vmin.f32 %v1718_v25, 6.0 }
 0x15c   : > { %v1651_v24 = vmul.f32 %v3066_v48, %v1615_v6  ;;  %v1518_v62 = vadd.f32 %v1486_v63, %v1420_v56  ;;  %v1322_v22 = vadd.f32 %v1290_v30, %v1224_v14  ;;  %v1193_v42 = vmul.f32 %v3036_v60, %v3539_v17  ;;  %v3228_v63 = vld [vmem:[#allocation2 + $0x140] sm:$0xff]  ;;  %v3247_v6 = vld [vmem:[#allocation2 + $0x150] sm:$0xff] }
 0x15d   : > { %v1932_v39 = vadd.f32 %v3198_v58, %v1896_v36  ;;  %v1029_v19 = vadd.f32 %v997_v4, %v931_v31  ;;  %v802_v49 = vmul.f32 %v2944_v44, %v3135_v35  ;;  %v1291_v50 = vmul.f32 %v2995_v2, %v3182_v61 }
 0x15e   : > { %v1687_v12 = vadd.f32 %v3090_v28, %v1651_v24  ;;  %v1616_v37 = vadd.f32 %v1584_v51, %v1518_v62  ;;  %v1421_v10 = vadd.f32 %v1389_v18, %v1322_v22  ;;  %v900_v16 = vmul.f32 %v2952_v45, %v867_v9  ;;  %v3541_v51 = vld [vmem:[#allocation10_spill] sm:$0xff] }
 0x15f   : > { %v1964_v47 = vadd.f32 %v2165_v41, %v1932_v39  ;;  %v1127_v11 = vadd.f32 %v1095_v52, %v1029_v19  ;;  %v998_v17 = vmul.f32 %v2963_v32, %v3137_v38  ;;  %v1390_v30 = vmul.f32 %v3072_v34, %v3228_v63  ;;  %v868_v38 = vld [vmem:[#allocation2 + $0x129] sm:$0xff] }
 0x160   : > { %v1652_v35 = vmul.f32 %v3066_v48, %v1616_v37  ;;  %v932_v21 = vadd.f32 %v900_v16, %v802_v49  ;;  %v1096_v57 = vmul.f32 %v3005_v55, %v3186_v53  ;;  %v1719_v1 = vmax.f32 %v1687_v12, 0.0  ;;  %v1553_v39 = vld [vmem:[#allocation2 + $0x142] sm:$0xff]  ;;  %v869_v12 = vld [vmem:[#allocation2 + $0x139] sm:$0xff] }
 0x161   : > { %1996 = vst [vmem:[%s3220_s26] sm:$0xff] %v1964_v47  ;;  %1852 = vmatmul.f32.gmra.mxu3 %v1750_v26  ;;  %v1225_v3 = vadd.f32 %v1193_v42, %v1127_v11  ;;  %v1519_v46 = vadd.f32 %v1487_v43, %v1421_v10  ;;  %v1585_v5 = vmul.f32 %v3051_v23, %v1552_v15  ;;  %v2166_v22 = vld [vmem:[%s2327_s30 + $0x8] sm:$0xff]  ;;  %v3542_v10 = vld [vmem:[#allocation11_spill] sm:$0xff] }
 0x162   : > { %v1799_v29 = vpop.f32.mrf.mxu1  ;;  %v1488_v18 = vmul.f32 %v3079_v27, %v3541_v51  ;;  %v1030_v4 = vadd.f32 %v998_v17, %v932_v21  ;;  %v1194_v36 = vmul.f32 %v3036_v60, %v3540_v33  ;;  %v1688_v14 = vadd.f32 %v3090_v28, %v1652_v35 }
 0x163   : > { %v1897_v40 = vmul.f32 %v3180_v0, %v1799_v29  ;;  %v1323_v25 = vadd.f32 %v1291_v50, %v1225_v3  ;;  %v1292_v43 = vmul.f32 %v2995_v2, %v1552_v15  ;;  %v803_v31 = vmul.f32 %v2944_v44, %v3160_v7 }
 0x164   : > { %v1128_v24 = vadd.f32 %v1096_v57, %v1030_v4  ;;  %v901_v62 = vmul.f32 %v2952_v45, %v868_v38  ;;  %v999_v33 = vmul.f32 %v2963_v32, %v3182_v61  ;;  %v1751_v26 = vmin.f32 %v1719_v1, 6.0  ;;  %v1554_v38 = vld [vmem:[#allocation2 + $0x152] sm:$0xff] }
 0x165   : > { %v1933_v56 = vadd.f32 %v3198_v58, %v1897_v40  ;;  %v1422_v52 = vadd.f32 %v1390_v30, %v1323_v25  ;;  %v1617_v19 = vadd.f32 %v1585_v5, %v1519_v46  ;;  %v1391_v42 = vmul.f32 %v3072_v34, %v3247_v6  ;;  %v1359_v25 = vld [vmem:[#allocation2 + $0x158] sm:$0xff] }
 0x166   : > { %v1226_v41 = vadd.f32 %v1194_v36, %v1128_v24  ;;  %v933_v47 = vadd.f32 %v901_v62, %v803_v31  ;;  %v1097_v7 = vmul.f32 %v3005_v55, %v3228_v63  ;;  %v1586_v37 = vmul.f32 %v3051_v23, %v1553_v39 }
 0x167   : > { %v1965_v9 = vadd.f32 %v2166_v22, %v1933_v56  ;;  %v1520_v49 = vadd.f32 %v1488_v18, %v1422_v52  ;;  %v1489_v61 = vmul.f32 %v3079_v27, %v3542_v10  ;;  %v1720_v50 = vmax.f32 %v1688_v14, 0.0  ;;  %v870_v56 = vld [vmem:[#allocation2 + $0x141] sm:$0xff]  ;;  %v2167_v14 = vld [vmem:[%s2327_s30 + $0x10] sm:$0xff] }
 0x168   : > { %v1324_v16 = vadd.f32 %v1292_v43, %v1226_v41  ;;  %v1031_v17 = vadd.f32 %v999_v33, %v933_v47  ;;  %v1195_v35 = vmul.f32 %v3036_v60, %v3541_v51  ;;  %v1653_v3 = vmul.f32 %v3066_v48, %v1617_v19 }
 0x169   : > { %1997 = vst [vmem:[%s3220_s26 + $0x8] sm:$0xff] %v1965_v9  ;;  %1855 = vmatmul.f32.gmra.mxu3 %v1751_v26  ;;  %v804_v30 = vmul.f32 %v2944_v44, %v3186_v53  ;;  %v902_v21 = vmul.f32 %v2952_v45, %v869_v12  ;;  %v1293_v1 = vmul.f32 %v2995_v2, %v1553_v39  ;;  %v1752_v4 = vmin.f32 %v1720_v50, 6.0 }
 0x16a   : > { %v1802_v11 = vpop.f32.mrf.mxu1  ;;  %v1423_v57 = vadd.f32 %v1391_v42, %v1324_v16  ;;  %v1129_v40 = vadd.f32 %v1097_v7, %v1031_v17  ;;  %v1000_v46 = vmul.f32 %v2963_v32, %v1552_v15  ;;  %v1098_v18 = vmul.f32 %v3005_v55, %v3247_v6  ;;  %v3295_v17 = vld [vmem:[#allocation2 + $0x168] sm:$0xff] }
 0x16b   : > { %v1898_v29 = vmul.f32 %v3180_v0, %v1802_v11  ;;  %v934_v51 = vadd.f32 %v902_v21, %v804_v30  ;;  %v1689_v31 = vadd.f32 %v3090_v28, %v1653_v3  ;;  %v1618_v52 = vadd.f32 %v1586_v37, %v1520_v49  ;;  %v2168_v3 = vld [vmem:[%s2327_s30 + $0x18] sm:$0xff] }
 0x16c   : > { %v1521_v36 = vadd.f32 %v1489_v61, %v1423_v57  ;;  %v1227_v53 = vadd.f32 %v1195_v35, %v1129_v40  ;;  %v1587_v15 = vmul.f32 %v3051_v23, %v1554_v38  ;;  %v1392_v33 = vmul.f32 %v3072_v34, %v1359_v25 }
 0x16d   : > { %v1934_v5 = vadd.f32 %v3198_v58, %v1898_v29  ;;  %v1032_v24 = vadd.f32 %v1000_v46, %v934_v51  ;;  %v1196_v22 = vmul.f32 %v3036_v60, %v3542_v10  ;;  %v805_v26 = vmul.f32 %v2944_v44, %v3228_v63  ;;  %v1555_v63 = vld [vmem:[#allocation2 + $0x15a] sm:$0xff] }
 0x16e   : > { %v1325_v62 = vadd.f32 %v1293_v1, %v1227_v53  ;;  %v903_v19 = vmul.f32 %v2952_v45, %v870_v56  ;;  %v1001_v49 = vmul.f32 %v2963_v32, %v1553_v39  ;;  %v1721_v47 = vmax.f32 %v1689_v31, 0.0  ;;  %v871_v39 = vld [vmem:[#allocation2 + $0x151] sm:$0xff] }
 0x16f   : > { %v1966_v43 = vadd.f32 %v2167_v14, %v1934_v5  ;;  %v1130_v9 = vadd.f32 %v1098_v18, %v1032_v24  ;;  %v1654_v7 = vmul.f32 %v3066_v48, %v1618_v52  ;;  %v1619_v37 = vadd.f32 %v1587_v15, %v1521_v36 }
 0x170   : > { %v935_v12 = vadd.f32 %v903_v19, %v805_v26  ;;  %v1490_v10 = vmul.f32 %v3079_v27, %v3015_v13  ;;  %v1424_v11 = vadd.f32 %v1392_v33, %v1325_v62  ;;  %v1294_v16 = vmul.f32 %v2995_v2, %v1554_v38  ;;  %v3316_v62 = vld [vmem:[#allocation2 + $0x16a] sm:$0xff] }
 0x171   : > { %1998 = vst [vmem:[%s3220_s26 + $0x10] sm:$0xff] %v1966_v43  ;;  %1858 = vmatmul.f32.gmra.mxu3 %v1752_v4  ;;  %v1228_v50 = vadd.f32 %v1196_v22, %v1130_v9  ;;  %v1099_v29 = vmul.f32 %v3005_v55, %v1359_v25  ;;  %v1753_v21 = vmin.f32 %v1721_v47, 6.0  ;;  %v1690_v57 = vadd.f32 %v3090_v28, %v1654_v7  ;;  %v1361_v19 = vld [vmem:[#allocation2 + $0x170] sm:$0xff]  ;;  %v2169_v7 = vld [vmem:[%s2327_s30 + $0x20] sm:$0xff] }
 0x172   : > { %v1805_v42 = vpop.f32.mrf.mxu1  ;;  %v1033_v35 = vadd.f32 %v1001_v49, %v935_v12  ;;  %v806_v40 = vmul.f32 %v2944_v44, %v3247_v6  ;;  %v1655_v1 = vmul.f32 %v3066_v48, %v1619_v37  ;;  %v1588_v46 = vmul.f32 %v3051_v23, %v1555_v63 }
 0x173   : > { %v1899_v41 = vmul.f32 %v3180_v0, %v1805_v42  ;;  %v904_v5 = vmul.f32 %v2952_v45, %v871_v39  ;;  %v1522_v51 = vadd.f32 %v1490_v10, %v1424_v11  ;;  %v1326_v18 = vadd.f32 %v1294_v16, %v1228_v50 }
 0x174   : > { %v1393_v4 = vmul.f32 %v3072_v34, %v3295_v17  ;;  %v1131_v53 = vadd.f32 %v1099_v29, %v1033_v35  ;;  %v1197_v56 = vmul.f32 %v3036_v60, %v3015_v13  ;;  %v1002_v6 = vmul.f32 %v2963_v32, %v1554_v38  ;;  %v1557_v35 = vld [vmem:[#allocation2 + $0x172] sm:$0xff] }
 0x175   : > { %v1935_v61 = vadd.f32 %v3198_v58, %v1899_v41  ;;  %v936_v14 = vadd.f32 %v904_v5, %v806_v40  ;;  %v1722_v31 = vmax.f32 %v1690_v57, 0.0  ;;  %v807_v52 = vmul.f32 %v2944_v44, %v1359_v25 }
 0x176   : > { %v1691_v24 = vadd.f32 %v3090_v28, %v1655_v1  ;;  %v1491_v15 = vmul.f32 %v3079_v27, %v3061_v54  ;;  %v1295_v33 = vmul.f32 %v2995_v2, %v1555_v63  ;;  %v905_v22 = vmul.f32 %v2952_v45, %v3015_v13 }
 0x177   : > { %v1967_v30 = vadd.f32 %v2168_v3, %v1935_v61  ;;  %v1620_v9 = vadd.f32 %v1588_v46, %v1522_v51  ;;  %v1425_v26 = vadd.f32 %v1393_v4, %v1326_v18  ;;  %v1003_v25 = vmul.f32 %v2963_v32, %v1555_v63  ;;  %v1363_v3 = vld [vmem:[#allocation2 + $0x188] sm:$0xff] }
 0x178   : > { %v1229_v42 = vadd.f32 %v1197_v56, %v1131_v53  ;;  %v1034_v49 = vadd.f32 %v1002_v6, %v936_v14  ;;  %v1100_v41 = vmul.f32 %v3005_v55, %v3295_v17  ;;  %v937_v47 = vadd.f32 %v905_v22, %v807_v52  ;;  %v1362_v6 = vld [vmem:[#allocation2 + $0x180] sm:$0xff] }
 0x179   : > { %1999 = vst [vmem:[%s3220_s26 + $0x18] sm:$0xff] %v1967_v30  ;;  %1861 = vmatmul.f32.gmra.mxu3 %v1753_v21  ;;  %v1754_v37 = vmin.f32 %v1722_v31, 6.0  ;;  %v1589_v13 = vmul.f32 %v3051_v23, %v3316_v62  ;;  %v1101_v10 = vmul.f32 %v3005_v55, %v1361_v19  ;;  %v1723_v61 = vmax.f32 %v1691_v24, 0.0 }
 0x17a   : > { %v1808_v36 = vpop.f32.mrf.mxu1  ;;  %v1394_v11 = vmul.f32 %v3072_v34, %v1361_v19  ;;  %v1035_v50 = vadd.f32 %v1003_v25, %v937_v47  ;;  %v1199_v63 = vmul.f32 %v3036_v60, %v3110_v8  ;;  %v1656_v16 = vmul.f32 %v3066_v48, %v1620_v9 }
 0x17b   : > { %v1900_v43 = vmul.f32 %v3180_v0, %v1808_v36  ;;  %v1523_v39 = vadd.f32 %v1491_v15, %v1425_v26  ;;  %v1198_v29 = vmul.f32 %v3036_v60, %v3061_v54  ;;  %v1327_v21 = vadd.f32 %v1295_v33, %v1229_v42  ;;  %v2170_v15 = vld [vmem:[%s2327_s30 + $0x28] sm:$0xff] }
 0x17c   : > { %v1132_v57 = vadd.f32 %v1100_v41, %v1034_v49  ;;  %v1133_v40 = vadd.f32 %v1101_v10, %v1035_v50  ;;  %v1297_v1 = vmul.f32 %v2995_v2, %v1557_v35  ;;  %v1755_v5 = vmin.f32 %v1723_v61, 6.0 }
 0x17d   : > { %v1936_v38 = vadd.f32 %v3198_v58, %v1900_v43  ;;  %v1492_v51 = vmul.f32 %v3079_v27, %v3110_v8  ;;  %v1396_v4 = vmul.f32 %v3072_v34, %v1363_v3  ;;  %v1692_v53 = vadd.f32 %v3090_v28, %v1656_v16 }
 0x17e   : > { %v1231_v18 = vadd.f32 %v1199_v63, %v1133_v40  ;;  %v1621_v56 = vadd.f32 %v1589_v13, %v1523_v39  ;;  %v1296_v14 = vmul.f32 %v2995_v2, %v3316_v62  ;;  %v1426_v43 = vadd.f32 %v1394_v11, %v1327_v21 }
 0x17f   : > { %v1968_v12 = vadd.f32 %v2169_v7, %v1936_v38  ;;  %v1230_v31 = vadd.f32 %v1198_v29, %v1132_v57  ;;  %v1494_v24 = vmul.f32 %v3079_v27, %v3189_v20  ;;  %v808_v22 = vmul.f32 %v2944_v44, %v3295_v17  ;;  %v1558_v29 = vld [vmem:[#allocation2 + $0x182] sm:$0xff] }
 0x180   : > { %v1329_v52 = vadd.f32 %v1297_v1, %v1231_v18  ;;  %v906_v38 = vmul.f32 %v2952_v45, %v3061_v54  ;;  %v809_v9 = vmul.f32 %v2944_v44, %v1361_v19  ;;  %v1590_v26 = vmul.f32 %v3051_v23, %v1557_v35 }
 0x181   : > { %2000 = vst [vmem:[%s3220_s26 + $0x20] sm:$0xff] %v1968_v12  ;;  %1864 = vmatmul.f32.gmra.mxu3 %v1754_v37  ;;  %v1395_v25 = vmul.f32 %v3072_v34, %v1362_v6  ;;  %v1724_v49 = vmax.f32 %v1692_v53, 0.0  ;;  %v1657_v41 = vmul.f32 %v3066_v48, %v1621_v56  ;;  %v907_v47 = vmul.f32 %v2952_v45, %v3110_v8  ;;  %v2172_v56 = vld [vmem:[%s2327_s30 + $0x38] sm:$0xff] }
 0x182   : > { %v1811_v30 = vpop.f32.mrf.mxu1  ;;  %v1428_v42 = vadd.f32 %v1396_v4, %v1329_v52  ;;  %v1005_v17 = vmul.f32 %v2963_v32, %v1557_v35  ;;  %v1524_v12 = vadd.f32 %v1492_v51, %v1426_v43  ;;  %v1328_v54 = vadd.f32 %v1296_v14, %v1230_v31  ;;  %v1559_v43 = vld [vmem:[#allocation2 + $0x18a] sm:$0xff] }
 0x183   : > { %v1901_v46 = vmul.f32 %v3180_v0, %v1811_v30  ;;  %v1004_v19 = vmul.f32 %v2963_v32, %v3316_v62  ;;  %v938_v13 = vadd.f32 %v906_v38, %v808_v22  ;;  %v939_v10 = vadd.f32 %v907_v47, %v809_v9  ;;  %v2171_v62 = vld [vmem:[%s2327_s30 + $0x30] sm:$0xff]  ;;  %v2173_v38 = vld [vmem:[#allocation2] sm:$0xff] }
 0x184   : > { %v1526_v44 = vadd.f32 %v1494_v24, %v1428_v42  ;;  %v1103_v61 = vmul.f32 %v3005_v55, %v1363_v3  ;;  %v1756_v45 = vmin.f32 %v1724_v49, 6.0  ;;  %v1201_v50 = vmul.f32 %v3036_v60, %v3189_v20  ;;  %v2174_v47 = vld [vmem:[%s2327_s30 + $0x40] sm:$0xff] }
 0x185   : > { %v1937_v36 = vadd.f32 %v3198_v58, %v1901_v46  ;;  %v1037_v8 = vadd.f32 %v1005_v17, %v939_v10  ;;  %v1693_v63 = vadd.f32 %v3090_v28, %v1657_v41  ;;  %v1622_v16 = vadd.f32 %v1590_v26, %v1524_v12  ;;  %v1462_v26 = vld [vmem:[#allocation2 + $0x199] sm:$0xff] }
 0x186   : > { %v1427_v39 = vadd.f32 %v1395_v25, %v1328_v54  ;;  %v1493_v32 = vmul.f32 %v3079_v27, %v3146_v59  ;;  %v1036_v30 = vadd.f32 %v1004_v19, %v938_v13  ;;  %v1102_v3 = vmul.f32 %v3005_v55, %v1362_v6  ;;  %v1560_v19 = vld [vmem:[#allocation2 + $0x19a] sm:$0xff] }
 0x187   : > { %v1969_v33 = vadd.f32 %v2170_v15, %v1937_v36  ;;  %v1135_v21 = vadd.f32 %v1103_v61, %v1037_v8  ;;  %v1725_v20 = vmax.f32 %v1693_v63, 0.0  ;;  %v1591_v46 = vmul.f32 %v3051_v23, %v1558_v29  ;;  %v2175_v63 = vld [vmem:[%s2327_s30 + $0x48] sm:$0xff] }
 0x188   : > { %v1525_v1 = vadd.f32 %v1493_v32, %v1427_v39  ;;  %v1658_v51 = vmul.f32 %v3066_v48, %v1622_v16  ;;  %v1134_v18 = vadd.f32 %v1102_v3, %v1036_v30  ;;  %v1200_v4 = vmul.f32 %v3036_v60, %v3146_v59 }
 0x189   : > { %2001 = vst [vmem:[%s3220_s26 + $0x28] sm:$0xff] %v1969_v33  ;;  %1867 = vmatmul.f32.gmra.mxu3 %v1755_v5  ;;  %v1233_v57 = vadd.f32 %v1201_v50, %v1135_v21  ;;  %v1757_v36 = vmin.f32 %v1725_v20, 6.0  ;;  %v1298_v52 = vmul.f32 %v2995_v2, %v1558_v29  ;;  %v1592_v60 = vmul.f32 %v3051_v23, %v1559_v43 }
 0x18a   : > { %v1814_v7 = vpop.f32.mrf.mxu1  ;;  %v1623_v53 = vadd.f32 %v1591_v46, %v1525_v1  ;;  %v1694_v6 = vadd.f32 %v3090_v28, %v1658_v51  ;;  %v1232_v31 = vadd.f32 %v1200_v4, %v1134_v18  ;;  %v1397_v9 = vmul.f32 %v2173_v38, %v3072_v34  ;;  %v2176_v1 = vld [vmem:[%s2327_s30 + $0x50] sm:$0xff] }
 0x18b   : > { %v1902_v37 = vmul.f32 %v3180_v0, %v1814_v7  ;;  %v1624_v49 = vadd.f32 %v1592_v60, %v1526_v44  ;;  %v1495_v41 = vmul.f32 %v3079_v27, %v1462_v26  ;;  %v1299_v54 = vmul.f32 %v2995_v2, %v1559_v43 }
 0x18c   : > { %v1659_v15 = vmul.f32 %v3066_v48, %v1623_v53  ;;  %v1726_v33 = vmax.f32 %v1694_v6, 0.0  ;;  %v1330_v22 = vadd.f32 %v1298_v52, %v1232_v31  ;;  %v1593_v61 = vmul.f32 %v3051_v23, %v1560_v19  ;;  %v2177_v53 = vld [vmem:[%s2327_s30 + $0x58] sm:$0xff] }
 0x18d   : > { %v1938_v11 = vadd.f32 %v3198_v58, %v1902_v37  ;;  %v1660_v13 = vmul.f32 %v3066_v48, %v1624_v49 }
 0x18e   : > { %v1695_v42 = vadd.f32 %v3090_v28, %v1659_v15  ;;  %v1758_v7 = vmin.f32 %v1726_v33, 6.0  ;;  %v1429_v12 = vadd.f32 %v1397_v9, %v1330_v22  ;;  %v2178_v15 = vld [vmem:[%s2327_s30 + $0x60] sm:$0xff]  ;;  %v2179_v22 = vld [vmem:[%s2327_s30 + $0x68] sm:$0xff] }
 0x18f   : > { %v1970_v35 = vadd.f32 %v2171_v62, %v1938_v11  ;;  %v1331_v11 = vadd.f32 %v1299_v54, %v1233_v57  ;;  %v1696_v2 = vadd.f32 %v3090_v28, %v1660_v13 }
 0x190   : > { %v1727_v34 = vmax.f32 %v1695_v42, 0.0  ;;  %v1527_v44 = vadd.f32 %v1495_v41, %v1429_v12  ;;  %v2180_v41 = vld [vmem:[%s2327_s30 + $0x70] sm:$0xff] }
 0x191   : > { %2002 = vst [vmem:[%s3220_s26 + $0x30] sm:$0xff] %v1970_v35  ;;  %1870 = vmatmul.f32.gmra.mxu3 %v1756_v45  ;;  %v1463_v45 = vld [vmem:[#allocation2 + $0x1a1] sm:$0xff]  ;;  %v1430_v32 = vadd.f32 %v1397_v9, %v1331_v11  ;;  %v1728_v30 = vmax.f32 %v1696_v2, 0.0 }
 0x192   : > { %v1817_v40 = vpop.f32.mrf.mxu1  ;;  %v1759_v50 = vmin.f32 %v1727_v34, 6.0  ;;  %v1625_v39 = vadd.f32 %v1593_v61, %v1527_v44  ;;  %v1496_v62 = vmul.f32 %v3079_v27, %v1463_v45  ;;  %v1561_v35 = vld [vmem:[#allocation2 + $0x1a2] sm:$0xff] }
 0x193   : > { %v1903_v5 = vmul.f32 %v3180_v0, %v1817_v40  ;;  %v1594_v40 = vmul.f32 %v3051_v23, %v1561_v35  ;;  %v1760_v27 = vmin.f32 %v1728_v30, 6.0  ;;  %v2183_v11 = vld [vmem:[%s2327_s30 + $0x88] sm:$0xff]  ;;  %v2185_v35 = vld [vmem:[%s2327_s30 + $0x98] sm:$0xff] }
 0x194   : > { %v1661_v21 = vmul.f32 %v3066_v48, %v1625_v39  ;;  %v1528_v57 = vadd.f32 %v1496_v62, %v1430_v32 }
 0x195   : > { %v1939_v55 = vadd.f32 %v3198_v58, %v1903_v5 }
 0x196   : > { %v1697_v5 = vadd.f32 %v3090_v28, %v1661_v21  ;;  %v1626_v51 = vadd.f32 %v1594_v40, %v1528_v57  ;;  %v2186_v57 = vld [vmem:[%s2327_s30 + $0xa0] sm:$0xff] }
 0x197   : > { %v1971_v14 = vadd.f32 %v2172_v56, %v1939_v55 }
 0x198   : > { %v1729_v55 = vmax.f32 %v1697_v5, 0.0 }
 0x199   : > { %2003 = vst [vmem:[%s3220_s26 + $0x38] sm:$0xff] %v1971_v14  ;;  %1873 = vmatmul.f32.gmra.mxu3 %v1757_v36  ;;  %v1662_v36 = vmul.f32 %v3066_v48, %v1626_v51 }
 0x19a   : > { %v1820_v24 = vpop.f32.mrf.mxu1  ;;  %v1761_v14 = vmin.f32 %v1729_v55, 6.0  ;;  %v2188_v55 = vld [vmem:[%s2327_s30 + $0xb0] sm:$0xff] }
 0x19b   : > { %v1904_v59 = vmul.f32 %v3180_v0, %v1820_v24  ;;  %v1698_v6 = vadd.f32 %v3090_v28, %v1662_v36 }
 0x19d   : > { %v1940_v25 = vadd.f32 %v3198_v58, %v1904_v59  ;;  %v1730_v52 = vmax.f32 %v1698_v6, 0.0 }
 0x19f   : > { %v1972_v17 = vadd.f32 %v2174_v47, %v1940_v25  ;;  %v1762_v60 = vmin.f32 %v1730_v52, 6.0 }
 0x1a1   : > { %2004 = vst [vmem:[%s3220_s26 + $0x40] sm:$0xff] %v1972_v17  ;;  %1876 = vmatmul.f32.gmra.mxu3 %v1758_v7  ;;  %v2181_v7 = vld [vmem:[%s2327_s30 + $0x80] sm:$0xff] }
 0x1a2   : > { %v1823_v37 = vpop.f32.mrf.mxu1 }
 0x1a3   : > { %v1905_v10 = vmul.f32 %v3180_v0, %v1823_v37 }
 0x1a5   : > { %v1941_v8 = vadd.f32 %v3198_v58, %v1905_v10  ;;  %v2182_v10 = vld [vmem:[%s2327_s30 + $0x78] sm:$0xff] }
 0x1a7   : > { %v1973_v16 = vadd.f32 %v2175_v63, %v1941_v8  ;;  %v2184_v63 = vld [vmem:[%s2327_s30 + $0x90] sm:$0xff] }
 0x1a9   : > { %2005 = vst [vmem:[%s3220_s26 + $0x48] sm:$0xff] %v1973_v16  ;;  %1879 = vmatmul.f32.gmra.mxu3 %v1759_v50 }
 0x1aa   : > { %v1826_v29 = vpop.f32.mrf.mxu1 }
 0x1ab   : > { %v1906_v3 = vmul.f32 %v3180_v0, %v1826_v29 }
 0x1ad   : > { %v1942_v20 = vadd.f32 %v3198_v58, %v1906_v3 }
 0x1af   : > { %v1974_v46 = vadd.f32 %v2176_v1, %v1942_v20 }
 0x1b1   : > { %2006 = vst [vmem:[%s3220_s26 + $0x50] sm:$0xff] %v1974_v46  ;;  %1882 = vmatmul.f32.gmra.mxu3 %v1760_v27  ;;  %v2187_v27 = vld [vmem:[%s2327_s30 + $0xa8] sm:$0xff] }
 0x1b2   : > { %v1829_v18 = vpop.f32.mrf.mxu1 }
 0x1b3   : > { %v1907_v4 = vmul.f32 %v3180_v0, %v1829_v18 }
 0x1b5   : > { %v1943_v23 = vadd.f32 %v3198_v58, %v1907_v4 }
 0x1b7   : > { %v1975_v56 = vadd.f32 %v2177_v53, %v1943_v23 }
 0x1b9   : > { %2007 = vst [vmem:[%s3220_s26 + $0x58] sm:$0xff] %v1975_v56  ;;  %1885 = vmatmul.f32.gmra.mxu3 %v1761_v14  ;;  %v2189_v14 = vld [vmem:[%s2327_s30 + $0xb8] sm:$0xff] }
 0x1ba   : > { %v1832_v43 = vpop.f32.mrf.mxu1 }
 0x1bb   : > { %v1908_v31 = vmul.f32 %v3180_v0, %v1832_v43 }
 0x1bd   : > { %v1944_v24 = vadd.f32 %v3198_v58, %v1908_v31 }
 0x1bf   : > { %v1976_v48 = vadd.f32 %v2178_v15, %v1944_v24  ;;  %v2190_v24 = vld [vmem:[%s2327_s30 + $0xc0] sm:$0xff] }
 0x1c1   : > { %2008 = vst [vmem:[%s3220_s26 + $0x60] sm:$0xff] %v1976_v48  ;;  %1888 = vmatmul.f32.gmra.mxu3 %v1762_v60 }
 0x1c2   : > { %v1835_v59 = vpop.f32.mrf.mxu1 }
 0x1c3   : > { %v1909_v28 = vmul.f32 %v3180_v0, %v1835_v59 }
 0x1c5   : > { %v1945_v33 = vadd.f32 %v3198_v58, %v1909_v28  ;;  %v2191_v28 = vld [vmem:[%s2327_s30 + $0xc8] sm:$0xff] }
 0x1c7   : > { %v1977_v38 = vadd.f32 %v2179_v22, %v1945_v33 }
 0x1c9   : > { %2009 = vst [vmem:[%s3220_s26 + $0x68] sm:$0xff] %v1977_v38 }
 0x1ca   : > { %v1838_v9 = vpop.f32.mrf.mxu1 }
 0x1cb   : > { %v1910_v26 = vmul.f32 %v3180_v0, %v1838_v9 }
 0x1cc   : > { %v1844_v25 = vpop.f32.mrf.mxu3 }
 0x1cd   : > { %v1946_v42 = vadd.f32 %v3198_v58, %v1910_v26  ;;  %v1912_v49 = vmul.f32 %v3180_v0, %v1844_v25  ;;  %v2192_v26 = vld [vmem:[%s2327_s30 + $0xd0] sm:$0xff] }
 0x1cf   : > { %v1978_v47 = vadd.f32 %v2180_v41, %v1946_v42  ;;  %v1948_v17 = vadd.f32 %v3198_v58, %v1912_v49 }
 0x1d1   : > { %2010 = vst [vmem:[%s3220_s26 + $0x70] sm:$0xff] %v1978_v47  ;;  %v1980_v12 = vadd.f32 %v2181_v7, %v1948_v17  ;;  %v2193_v47 = vld [vmem:[%s2327_s30 + $0xd8] sm:$0xff] }
 0x1d2   : > { %v1841_v54 = vpop.f32.mrf.mxu1 }
 0x1d3   : > { %2012 = vst [vmem:[%s3220_s26 + $0x80] sm:$0xff] %v1980_v12  ;;  %v1911_v19 = vmul.f32 %v3180_v0, %v1841_v54 }
 0x1d4   : > { %v1847_v37 = vpop.f32.mrf.mxu3 }
 0x1d5   : > { %v1947_v34 = vadd.f32 %v3198_v58, %v1911_v19  ;;  %v1913_v13 = vmul.f32 %v3180_v0, %v1847_v37  ;;  %v2194_v19 = vld [vmem:[%s2327_s30 + $0xe0] sm:$0xff] }
 0x1d7   : > { %v1979_v44 = vadd.f32 %v2182_v10, %v1947_v34  ;;  %v1949_v61 = vadd.f32 %v3198_v58, %v1913_v13 }
 0x1d9   : > { %2011 = vst [vmem:[%s3220_s26 + $0x78] sm:$0xff] %v1979_v44  ;;  %v1981_v45 = vadd.f32 %v2183_v11, %v1949_v61  ;;  %v2195_v44 = vld [vmem:[%s2327_s30 + $0xe8] sm:$0xff] }
 0x1db   : > { %2013 = vst [vmem:[%s3220_s26 + $0x88] sm:$0xff] %v1981_v45 }
 0x1dc   : > { %v1850_v8 = vpop.f32.mrf.mxu3 }
 0x1dd   : > { %v1914_v50 = vmul.f32 %v3180_v0, %v1850_v8 }
 0x1df   : > { %v1950_v2 = vadd.f32 %v3198_v58, %v1914_v50  ;;  %v2196_v50 = vld [vmem:[%s2327_s30 + $0xf0] sm:$0xff] }
 0x1e1   : > { %v1982_v16 = vadd.f32 %v2184_v63, %v1950_v2 }
 0x1e3   : > { %2014 = vst [vmem:[%s3220_s26 + $0x90] sm:$0xff] %v1982_v16 }
 0x1e4   : > { %v1853_v39 = vpop.f32.mrf.mxu3 }
 0x1e5   : > { %v1915_v32 = vmul.f32 %v3180_v0, %v1853_v39 }
 0x1e7   : > { %v1951_v62 = vadd.f32 %v3198_v58, %v1915_v32  ;;  %v2197_v32 = vld [vmem:[%s2327_s30 + $0xf8] sm:$0xff] }
 0x1e9   : > { %v1983_v29 = vadd.f32 %v2185_v35, %v1951_v62 }
 0x1eb   : > { %2015 = vst [vmem:[%s3220_s26 + $0x98] sm:$0xff] %v1983_v29 }
 0x1ec   : > { %v1856_v30 = vpop.f32.mrf.mxu3 }
 0x1ed   : > { %v1916_v3 = vmul.f32 %v3180_v0, %v1856_v30 }
 0x1ef   : > { %v1952_v21 = vadd.f32 %v3198_v58, %v1916_v3 }
 0x1f1   : > { %v1984_v40 = vadd.f32 %v2186_v57, %v1952_v21 }
 0x1f3   : > { %2016 = vst [vmem:[%s3220_s26 + $0xa0] sm:$0xff] %v1984_v40 }
 0x1f4   : > { %v1859_v20 = vpop.f32.mrf.mxu3 }
 0x1f5   : > { %v1917_v1 = vmul.f32 %v3180_v0, %v1859_v20 }
 0x1f7   : > { %v1953_v46 = vadd.f32 %v3198_v58, %v1917_v1 }
 0x1f9   : > { %v1985_v5 = vadd.f32 %v2187_v27, %v1953_v46 }
 0x1fb   : > { %2017 = vst [vmem:[%s3220_s26 + $0xa8] sm:$0xff] %v1985_v5 }
 0x1fc   : > { %v1862_v51 = vpop.f32.mrf.mxu3 }
 0x1fd   : > { %v1918_v18 = vmul.f32 %v3180_v0, %v1862_v51 }
 0x1ff   : > { %v1954_v4 = vadd.f32 %v3198_v58, %v1918_v18 }
 0x201   : > { %v1986_v36 = vadd.f32 %v2188_v55, %v1954_v4 }
 0x203   : > { %2018 = vst [vmem:[%s3220_s26 + $0xb0] sm:$0xff] %v1986_v36 }
 0x204   : > { %v1865_v23 = vpop.f32.mrf.mxu3 }
 0x205   : > { %v1919_v53 = vmul.f32 %v3180_v0, %v1865_v23 }
 0x207   : > { %v1955_v56 = vadd.f32 %v3198_v58, %v1919_v53 }
 0x209   : > { %v1987_v6 = vadd.f32 %v2189_v14, %v1955_v56 }
 0x20b   : > { %2019 = vst [vmem:[%s3220_s26 + $0xb8] sm:$0xff] %v1987_v6 }
 0x20c   : > { %v1868_v43 = vpop.f32.mrf.mxu3 }
 0x20d   : > { %v1920_v31 = vmul.f32 %v3180_v0, %v1868_v43 }
 0x20f   : > { %v1956_v52 = vadd.f32 %v3198_v58, %v1920_v31 }
 0x211   : > { %v1988_v15 = vadd.f32 %v2190_v24, %v1956_v52 }
 0x213   : > { %2020 = vst [vmem:[%s3220_s26 + $0xc0] sm:$0xff] %v1988_v15 }
 0x214   : > { %v1871_v48 = vpop.f32.mrf.mxu3 }
 0x215   : > { %v1921_v60 = vmul.f32 %v3180_v0, %v1871_v48 }
 0x217   : > { %v1957_v59 = vadd.f32 %v3198_v58, %v1921_v60 }
 0x219   : > { %v1989_v33 = vadd.f32 %v2191_v28, %v1957_v59 }
 0x21b   : > { %2021 = vst [vmem:[%s3220_s26 + $0xc8] sm:$0xff] %v1989_v33 }
 0x21c   : > { %v1874_v22 = vpop.f32.mrf.mxu3 }
 0x21d   : > { %v1922_v38 = vmul.f32 %v3180_v0, %v1874_v22 }
 0x21f   : > { %v1958_v9 = vadd.f32 %v3198_v58, %v1922_v38 }
 0x221   : > { %v1990_v25 = vadd.f32 %v2192_v26, %v1958_v9 }
 0x223   : > { %2022 = vst [vmem:[%s3220_s26 + $0xd0] sm:$0xff] %v1990_v25 }
 0x224   : > { %v1877_v42 = vpop.f32.mrf.mxu3 }
 0x225   : > { %v1923_v49 = vmul.f32 %v3180_v0, %v1877_v42 }
 0x227   : > { %v1959_v41 = vadd.f32 %v3198_v58, %v1923_v49 }
 0x229   : > { %v1991_v17 = vadd.f32 %v2193_v47, %v1959_v41 }
 0x22b   : > { %2023 = vst [vmem:[%s3220_s26 + $0xd8] sm:$0xff] %v1991_v17 }
 0x22c   : > { %v1880_v7 = vpop.f32.mrf.mxu3 }
 0x22d   : > { %v1924_v12 = vmul.f32 %v3180_v0, %v1880_v7 }
 0x22f   : > { %v1960_v54 = vadd.f32 %v3198_v58, %v1924_v12 }
 0x231   : > { %v1992_v37 = vadd.f32 %v2194_v19, %v1960_v54 }
 0x233   : > { %2024 = vst [vmem:[%s3220_s26 + $0xe0] sm:$0xff] %v1992_v37 }
 0x234   : > { %v1883_v34 = vpop.f32.mrf.mxu3 }
 0x235   : > { %v1925_v13 = vmul.f32 %v3180_v0, %v1883_v34 }
 0x237   : > { %v1961_v10 = vadd.f32 %v3198_v58, %v1925_v13 }
 0x239   : > { %v1993_v61 = vadd.f32 %v2195_v44, %v1961_v10 }
 0x23b   : > { %2025 = vst [vmem:[%s3220_s26 + $0xe8] sm:$0xff] %v1993_v61 }
 0x23c   : > { %v1886_v11 = vpop.f32.mrf.mxu3 }
 0x23d   : > { %v1926_v45 = vmul.f32 %v3180_v0, %v1886_v11 }
 0x23f   : > { %v1962_v8 = vadd.f32 %v3198_v58, %v1926_v45 }
 0x241   : > { %v1994_v2 = vadd.f32 %v2196_v50, %v1962_v8 }
 0x243   : > { %2026 = vst [vmem:[%s3220_s26 + $0xf0] sm:$0xff] %v1994_v2 }
 0x244   : > { %v1889_v63 = vpop.f32.mrf.mxu3 }
 0x245   : > { %v1927_v16 = vmul.f32 %v3180_v0, %v1889_v63 }
 0x247   : > { %v1963_v39 = vadd.f32 %v3198_v58, %v1927_v16 }
 0x249   : > { %v1995_v62 = vadd.f32 %v2197_v32, %v1963_v39 }
 0x24b   : > { %2027 = vst [vmem:[%s3220_s26 + $0xf8] sm:$0xff] %v1995_v62 }
 0x24c PF: > { %s20_s13 = sadd.s32 1, %s2204_s13  }
 0x24d   : > { %p17_p4 = scmp.ge.s32.totalorder %s20_s13, 4  }
 0x24f   :  { %19 = sbr.rel (!%p17_p4) target bundleno = 1 (0x1), region = 92 }

</bundles_post_ra>
